<compile_context>
chip_gen: v6e
topology: v6e:2x2x1
jax: 0.10.0
libtpu: 0.0.40
codegen_flags: <defaults>
</compile_context>

<pallas_src>
import numpy as np
import jax
import jax.numpy as jnp
from jax.experimental import pallas as pl
from jax.experimental.pallas import tpu as pltpu

LANE = 128
NEG_INF = -1e30
VMEM_LIMIT = 32 * 1024 * 1024   # fits v5e/v6e (128 MiB) and v7x (64 MiB) budgets


def _round_up(x, m):
    return ((x + m - 1) // m) * m


# --------------------------------------------------------------------------
# Pallas kernels
# --------------------------------------------------------------------------

def det_head(xflat, w1p, b1p, w2p, b2p, *, wp):
    """Fused 3x3-conv detection head (conv -> ReLU -> 1x1 -> sigmoid).

    xflat: (N, C, PIXP) f32  zero-padded page, channel-major, spatially
           flattened row-major over the (H+2, W+2) grid, pixel axis padded to
           a multiple of 128 (lane-dense).
    w1p:   (H1P, 9*C) bf16  transposed conv weights, hidden padded to 128,
           columns ordered offset-major then channel (im2col order).
    b1p:   (H1P, 1) f32, w2p: (H1P, 1) f32, b2p: (1, 1) f32 scalar (SMEM).
    Returns (N, 1, PIXP) f32 text probabilities on the padded pixel grid.
    """
    n, c, pixp = xflat.shape
    h1p, k9 = w1p.shape
    offsets = [(dy, dx) for dy in (-1, 0, 1) for dx in (-1, 0, 1)]

    def kernel(x_ref, w1_ref, b1_ref, w2_ref, b2_ref, o_ref, patch_ref):
        x = x_ref[0]                                        # (C, PIXP) f32
        # Fused im2col: each 3x3 neighbour is a lane rotation of the flat
        # padded image (wrap-around only lands on padding pixels, which are
        # cropped away in the wrapper).  Stack the 9 shifted views into a
        # small VMEM scratch so the MXU runs ONE matmul with K = 9*C instead
        # of 9 matmuls with K = C.
        for o, (dy, dx) in enumerate(offsets):
            s = dy * wp + dx
            v = x if s == 0 else pltpu.roll(x, (-s) % pixp, 1)
            patch_ref[o * c:(o + 1) * c, :] = v             # static 4-row slab
        patches = patch_ref[...].astype(jnp.bfloat16)       # (9C, PIXP)
        acc = jnp.dot(w1_ref[...], patches,
                      preferred_element_type=jnp.float32)   # (H1P, PIXP) f32
        h = jnp.maximum(acc + b1_ref[...], 0.0)
        # Second layer has output width 1 -> VPU multiply + sublane reduction
        # instead of an (M x 1) MXU matmul.
        logits = jnp.sum(h * w2_ref[...], axis=0, keepdims=True) + b2_ref[0, 0]
        o_ref[0] = jax.nn.sigmoid(logits)                   # (1, PIXP) f32

    return pl.pallas_call(
        kernel,
        out_shape=jax.ShapeDtypeStruct((n, 1, pixp), jnp.float32),
        grid_spec=pltpu.PrefetchScalarGridSpec(
            num_scalar_prefetch=0,
            grid=(n,),
            in_specs=[
                pl.BlockSpec((1, c, pixp), lambda i: (i, 0, 0)),
                pl.BlockSpec((h1p, k9), lambda i: (0, 0)),
                pl.BlockSpec((h1p, 1), lambda i: (0, 0)),
                pl.BlockSpec((h1p, 1), lambda i: (0, 0)),
                pl.BlockSpec(memory_space=pltpu.MemorySpace.SMEM),
            ],
            out_specs=pl.BlockSpec((1, 1, pixp), lambda i: (i, 0, 0)),
            scratch_shapes=[pltpu.VMEM((k9, pixp), jnp.float32)],
        ),
        compiler_params=pltpu.CompilerParams(
            dimension_semantics=("parallel",),
            vmem_limit_bytes=VMEM_LIMIT),
    )(xflat, w1p, b1p, w2p, b2p)


def _reco_head_kernel(x_ref, w1_ref, w2_ref, b2_ref, o_ref):
    """Per-timestep MLP -> log-softmax over the (128-padded) vocab."""
    h = jnp.dot(x_ref[...], w1_ref[...], preferred_element_type=jnp.float32)
    h = jnp.maximum(h, 0.0)
    logits = jnp.dot(h.astype(jnp.bfloat16), w2_ref[...],
                     preferred_element_type=jnp.float32) + b2_ref[...]
    m = jnp.max(logits, axis=-1, keepdims=True)
    e = jnp.exp(logits - m)
    o_ref[...] = logits - m - jnp.log(jnp.sum(e, axis=-1, keepdims=True))


def reco_head(x, w1p, w2p, b2p, *, row_tile=256):
    """x: (rows, 128) bf16 (bias channel folded in) -> (rows, 128) f32 logp."""
    rows, fp = x.shape
    h1p = w1p.shape[1]
    vp = w2p.shape[1]
    tile = min(row_tile, _round_up(rows, 8))
    rows_p = _round_up(rows, tile)
    if rows_p != rows:
        x = jnp.pad(x, ((0, rows_p - rows), (0, 0)))
    out = pl.pallas_call(
        _reco_head_kernel,
        out_shape=jax.ShapeDtypeStruct((rows_p, vp), jnp.float32),
        grid_spec=pltpu.PrefetchScalarGridSpec(
            num_scalar_prefetch=0,
            grid=(rows_p // tile,),
            in_specs=[
                pl.BlockSpec((tile, fp), lambda i: (i, 0)),
                pl.BlockSpec((fp, h1p), lambda i: (0, 0)),
                pl.BlockSpec((h1p, vp), lambda i: (0, 0)),
                pl.BlockSpec((1, vp), lambda i: (0, 0)),
            ],
            out_specs=pl.BlockSpec((tile, vp), lambda i: (i, 0)),
        ),
        compiler_params=pltpu.CompilerParams(
            dimension_semantics=("parallel",),
            vmem_limit_bytes=VMEM_LIMIT),
    )(x, w1p, w2p, b2p)
    return out[:rows]


# --------------------------------------------------------------------------
# One-time host-side parameter prep (pad to 128, transpose, fold biases, bf16)
# --------------------------------------------------------------------------

def prep_det_params(w1, b1, w2, b2, *, c, h1p=LANE):
    k, h1 = w1.shape
    assert k == 9 * c and h1 <= h1p
    # (9*C, H1) im2col weights -> (H1P, 9*C), column order = offset-major,
    # channel within offset (matches the in-kernel patch stack).
    w1p = jnp.zeros((h1p, 9 * c), jnp.float32).at[:h1, :].set(jnp.transpose(w1))
    b1p = jnp.zeros((h1p, 1), jnp.float32).at[:h1, 0].set(jnp.reshape(b1, (-1,)))
    w2p = jnp.zeros((h1p, 1), jnp.float32).at[:h1, :].set(w2)
    b2p = jnp.reshape(b2, (1, 1)).astype(jnp.float32)
    return w1p.astype(jnp.bfloat16), b1p, w2p, b2p


def prep_reco_params(w1, b1, w2, b2, *, fp=LANE, h1p=LANE, vp=LANE):
    feat, h1 = w1.shape
    vocab = w2.shape[1]
    assert feat + 1 <= fp and h1 <= h1p and vocab <= vp
    w1p = jnp.zeros((fp, h1p), jnp.float32)
    w1p = w1p.at[:feat, :h1].set(w1)
    w1p = w1p.at[feat, :h1].set(jnp.reshape(b1, (-1,)))      # bias via const-1 channel
    w2p = jnp.zeros((h1p, vp), jnp.float32).at[:h1, :vocab].set(w2)
    b2p = jnp.full((1, vp), NEG_INF, jnp.float32).at[0, :vocab].set(
        jnp.reshape(b2, (-1,)))                              # padded classes masked
    return w1p.astype(jnp.bfloat16), w2p.astype(jnp.bfloat16), b2p


# --------------------------------------------------------------------------
# Glue (device-side, kept inside one jit): det, crop prep, reco argmax
# --------------------------------------------------------------------------

def det_predictor(pages_nchw, det_prepped):
    """Pages (N, C, H, W) -> per-page text probability map (N, H, W)."""
    n, c, h, w = pages_nchw.shape
    hp, wp = h + 2, w + 2
    l = hp * wp
    pixp = _round_up(l, LANE)
    xp = jnp.pad(pages_nchw, ((0, 0), (0, 0), (1, 1), (1, 1)))
    xflat = jnp.pad(xp.reshape(n, c, l), ((0, 0), (0, 0), (0, pixp - l)))
    prob = det_head(xflat, *det_prepped, wp=wp)              # (N, 1, PIXP)
    return prob[:, 0, :l].reshape(n, hp, wp)[:, 1:h + 1, 1:w + 1]


def prepare_crops(prob_map, pages_nhwc, *, cell=4, topk=2):
    """Top-k score cells -> (boxes (N,topk,5), crops (N*topk, cell, cell, C))."""
    n, h, w = prob_map.shape
    c = pages_nhwc.shape[-1]
    gh, gw = h // cell, w // cell
    cell_scores = prob_map.reshape(n, gh, cell, gw, cell).mean(axis=(2, 4))
    scores, idx = jax.lax.top_k(cell_scores.reshape(n, gh * gw), topk)
    cy, cx = idx // gw, idx % gw
    boxes = jnp.stack([cx * cell / w, cy * cell / h,
                       (cx + 1) * cell / w, (cy + 1) * cell / h, scores], axis=-1)

    p_idx = jnp.repeat(jnp.arange(n), topk)
    ys = (cy * cell).reshape(-1)
    xs = (cx * cell).reshape(-1)

    def _slice_one(p, y, x):
        return jax.lax.dynamic_slice(pages_nhwc, (p, y, x, 0),
                                     (1, cell, cell, c))[0]

    crops = jax.vmap(_slice_one)(p_idx, ys, xs)              # no Python loop
    return boxes, crops


def reco_predict_ids(crops, reco_prepped):
    """Crops -> per-timestep argmax char ids (device-side)."""
    m, ch, cw, c = crops.shape
    feat = ch * c
    fp = reco_prepped[0].shape[0]
    x = crops.transpose(0, 2, 1, 3).reshape(m * cw, feat)    # timesteps = width
    xpad = jnp.zeros((m * cw, fp), jnp.float32)
    xpad = xpad.at[:, :feat].set(x).at[:, feat].set(1.0)     # constant bias channel
    logp = reco_head(xpad.astype(jnp.bfloat16), *reco_prepped)
    return jnp.argmax(logp, axis=-1).reshape(m, cw)          # pads never win


# --------------------------------------------------------------------------
# Host-side decode & document assembly
# --------------------------------------------------------------------------

def ctc_greedy_decode(pred_ids, vocab):
    words = []
    for seq in pred_ids:                                     # blank = 0
        out, prev = [], -1
        for s in seq:
            s = int(s)
            if s != prev and s != 0:
                out.append(vocab[s - 1])
            prev = s
        words.append("".join(out))
    return words


def doc_builder(boxes, words, page_shapes, topk):
    boxes = np.asarray(boxes)
    pages_out = []
    for p, shape in enumerate(page_shapes):
        page_words = []
        for k in range(topk):
            page_words.append({
                "geometry": boxes[p, k, :4].tolist(),
                "objectness": float(boxes[p, k, 4]),
                "value": words[p * topk + k],
            })
        pages_out.append({"dimensions": shape, "words": page_words})
    return {"pages": pages_out}


def ocr_predictor_forward(pages, det_params, reco_params, vocab, *, topk=2, cell=4):
    """Forward of OCRPredictor on a list of CHW pages."""
    if any(p.ndim != 3 for p in pages):
        raise ValueError("incorrect input shape: all pages are expected to be "
                         "multi-channel 2D images.")
    pages_nchw = jnp.stack([jnp.asarray(p) for p in pages], axis=0)   # (N,C,H,W)
    det_prepped = prep_det_params(*det_params, c=pages_nchw.shape[1])
    reco_prepped = prep_reco_params(*reco_params)

    def _pipeline(pages_nchw, det_prepped, reco_prepped):
        pages_nhwc = jnp.transpose(pages_nchw, (0, 2, 3, 1))
        prob_map = det_predictor(pages_nchw, det_prepped)              # det
        boxes, crops = prepare_crops(prob_map, pages_nhwc,
                                     cell=cell, topk=topk)             # _prepare_crops
        pred_ids = reco_predict_ids(crops, reco_prepped)               # reco
        return boxes, pred_ids

    boxes, pred_ids = jax.jit(_pipeline)(pages_nchw, det_prepped, reco_prepped)
    boxes, pred_ids = jax.block_until_ready((boxes, pred_ids))         # single sync
    words = ctc_greedy_decode(np.asarray(pred_ids), vocab)
    page_shapes = [tuple(int(s) for s in p.shape[-2:]) for p in pages]
    return doc_builder(np.asarray(boxes), words, page_shapes, topk)    # doc_builder


# --------------------------------------------------------------------------
# Main
# --------------------------------------------------------------------------

if __name__ == "__main__":
    key = jax.random.PRNGKey(0)
    kp, k1, k2, k3, k4, k5, k6, k7, k8 = jax.random.split(key, 9)

    # 2 pages, torch-style CHW: [C=4, H=16, W=16]
    N, C, H, W = 2, 4, 16, 16
    pages_arr = jax.random.uniform(kp, (N, C, H, W), dtype=jnp.float32)
    pages = [pages_arr[i] for i in range(N)]

    # detection head params (natural shapes; padded/transposed on the host)
    DET_HIDDEN = 32
    det_params = (
        jax.random.normal(k1, (9 * C, DET_HIDDEN), jnp.float32) * 0.1,
        jax.random.normal(k2, (1, DET_HIDDEN), jnp.float32) * 0.1,
        jax.random.normal(k3, (DET_HIDDEN, 1), jnp.float32) * 0.1,
        jax.random.normal(k4, (1, 1), jnp.float32) * 0.1,
    )

    # recognition head params: per-timestep (cell*C -> hidden -> vocab)
    CELL = 4
    RECO_HIDDEN = 32
    VOCAB = "abcdefghijklmno"          # 15 chars, index 0 is the CTC blank
    VOCAB_SIZE = len(VOCAB) + 1
    reco_params = (
        jax.random.normal(k5, (CELL * C, RECO_HIDDEN), jnp.float32) * 0.1,
        jax.random.normal(k6, (1, RECO_HIDDEN), jnp.float32) * 0.1,
        jax.random.normal(k7, (RECO_HIDDEN, VOCAB_SIZE), jnp.float32) * 0.1,
        jax.random.normal(k8, (1, VOCAB_SIZE), jnp.float32) * 0.1,
    )

    doc = ocr_predictor_forward(pages, det_params, reco_params, VOCAB,
                                topk=2, cell=CELL)
    assert len(doc["pages"]) == N
    assert all(len(p["words"]) == 2 for p in doc["pages"])
    print("KERNEL_OK")
</pallas_src>

<mosaic_0001>
module attributes {stable_mosaic.version = 11 : i64} {
  func.func @kernel(%arg0: i32, %arg1: memref<1x4x384xf32, #tpu.memory_space<vmem>>, %arg2: memref<128x36xbf16, #tpu.memory_space<vmem>>, %arg3: memref<128x1xf32, #tpu.memory_space<vmem>>, %arg4: memref<128x1xf32, #tpu.memory_space<vmem>>, %arg5: memref<1x1xf32, #tpu.memory_space<smem>>, %arg6: memref<1x1x384xf32, #tpu.memory_space<vmem>>, %arg7: memref<36x384xf32, #tpu.memory_space<vmem>>) attributes {dimension_semantics = [#tpu.dimension_semantics<parallel>], iteration_bounds = array<i64: 2>, scalar_prefetch = 0 : i64, scratch_operands = 1 : i64, tpu.core_type = #tpu.core_type<tc>, window_params = [{transform_indices = @transform_0, window_bounds = array<i64: 1, 4, 384>}, {pipeline_mode = #tpu.pipeline_mode<synchronous>, transform_indices = @transform_1, window_bounds = array<i64: 128, 36>}, {pipeline_mode = #tpu.pipeline_mode<synchronous>, transform_indices = @transform_2, window_bounds = array<i64: 128, 1>}, {pipeline_mode = #tpu.pipeline_mode<synchronous>, transform_indices = @transform_3, window_bounds = array<i64: 128, 1>}, {transform_indices = @transform_4, window_bounds = array<i64: 1, 1>}, {transform_indices = @transform_5, window_bounds = array<i64: 1, 1, 384>}]} {
    %c0 = arith.constant 0 : index
    %c0_0 = arith.constant 0 : index
    %c0_1 = arith.constant 0 : index
    %0 = vector.load %arg1[%c0, %c0_0, %c0_1] : memref<1x4x384xf32, #tpu.memory_space<vmem>>, vector<1x4x384xf32>
    %1 = vector.shape_cast %0 : vector<1x4x384xf32> to vector<4x384xf32>
    %c19_i32 = arith.constant 19 : i32
    %2 = tpu.dynamic_rotate %1 by %c19_i32 dim 1 : vector<4x384xf32>, i32 -> vector<4x384xf32>
    %c0_2 = arith.constant 0 : index
    %c0_3 = arith.constant 0 : index
    %3 = vector.load %arg7[%c0_2, %c0_3] : memref<36x384xf32, #tpu.memory_space<vmem>>, vector<4x384xf32>
    tpu.vector_store %arg7[%c0_2, %c0_3], %2 {strides = array<i32>} : memref<36x384xf32, #tpu.memory_space<vmem>>, vector<4x384xf32>,
    %c18_i32 = arith.constant 18 : i32
    %4 = tpu.dynamic_rotate %1 by %c18_i32 dim 1 : vector<4x384xf32>, i32 -> vector<4x384xf32>
    %c4 = arith.constant 4 : index
    %c0_4 = arith.constant 0 : index
    %5 = vector.load %arg7[%c4, %c0_4] : memref<36x384xf32, #tpu.memory_space<vmem>>, vector<4x384xf32>
    tpu.vector_store %arg7[%c4, %c0_4], %4 {strides = array<i32>} : memref<36x384xf32, #tpu.memory_space<vmem>>, vector<4x384xf32>,
    %c17_i32 = arith.constant 17 : i32
    %6 = tpu.dynamic_rotate %1 by %c17_i32 dim 1 : vector<4x384xf32>, i32 -> vector<4x384xf32>
    %c8 = arith.constant 8 : index
    %c0_5 = arith.constant 0 : index
    %7 = vector.load %arg7[%c8, %c0_5] : memref<36x384xf32, #tpu.memory_space<vmem>>, vector<4x384xf32>
    tpu.vector_store %arg7[%c8, %c0_5], %6 {strides = array<i32>} : memref<36x384xf32, #tpu.memory_space<vmem>>, vector<4x384xf32>,
    %c1_i32 = arith.constant 1 : i32
    %8 = tpu.dynamic_rotate %1 by %c1_i32 dim 1 : vector<4x384xf32>, i32 -> vector<4x384xf32>
    %c12 = arith.constant 12 : index
    %c0_6 = arith.constant 0 : index
    %9 = vector.load %arg7[%c12, %c0_6] : memref<36x384xf32, #tpu.memory_space<vmem>>, vector<4x384xf32>
    tpu.vector_store %arg7[%c12, %c0_6], %8 {strides = array<i32>} : memref<36x384xf32, #tpu.memory_space<vmem>>, vector<4x384xf32>,
    %c16 = arith.constant 16 : index
    %c0_7 = arith.constant 0 : index
    %10 = vector.load %arg7[%c16, %c0_7] : memref<36x384xf32, #tpu.memory_space<vmem>>, vector<4x384xf32>
    tpu.vector_store %arg7[%c16, %c0_7], %1 {strides = array<i32>} : memref<36x384xf32, #tpu.memory_space<vmem>>, vector<4x384xf32>,
    %c383_i32 = arith.constant 383 : i32
    %11 = tpu.dynamic_rotate %1 by %c383_i32 dim 1 : vector<4x384xf32>, i32 -> vector<4x384xf32>
    %c20 = arith.constant 20 : index
    %c0_8 = arith.constant 0 : index
    %12 = vector.load %arg7[%c20, %c0_8] : memref<36x384xf32, #tpu.memory_space<vmem>>, vector<4x384xf32>
    tpu.vector_store %arg7[%c20, %c0_8], %11 {strides = array<i32>} : memref<36x384xf32, #tpu.memory_space<vmem>>, vector<4x384xf32>,
    %c367_i32 = arith.constant 367 : i32
    %13 = tpu.dynamic_rotate %1 by %c367_i32 dim 1 : vector<4x384xf32>, i32 -> vector<4x384xf32>
    %c24 = arith.constant 24 : index
    %c0_9 = arith.constant 0 : index
    %14 = vector.load %arg7[%c24, %c0_9] : memref<36x384xf32, #tpu.memory_space<vmem>>, vector<4x384xf32>
    tpu.vector_store %arg7[%c24, %c0_9], %13 {strides = array<i32>} : memref<36x384xf32, #tpu.memory_space<vmem>>, vector<4x384xf32>,
    %c366_i32 = arith.constant 366 : i32
    %15 = tpu.dynamic_rotate %1 by %c366_i32 dim 1 : vector<4x384xf32>, i32 -> vector<4x384xf32>
    %c28 = arith.constant 28 : index
    %c0_10 = arith.constant 0 : index
    %16 = vector.load %arg7[%c28, %c0_10] : memref<36x384xf32, #tpu.memory_space<vmem>>, vector<4x384xf32>
    tpu.vector_store %arg7[%c28, %c0_10], %15 {strides = array<i32>} : memref<36x384xf32, #tpu.memory_space<vmem>>, vector<4x384xf32>,
    %c365_i32 = arith.constant 365 : i32
    %17 = tpu.dynamic_rotate %1 by %c365_i32 dim 1 : vector<4x384xf32>, i32 -> vector<4x384xf32>
    %c32 = arith.constant 32 : index
    %c0_11 = arith.constant 0 : index
    %18 = vector.load %arg7[%c32, %c0_11] : memref<36x384xf32, #tpu.memory_space<vmem>>, vector<4x384xf32>
    tpu.vector_store %arg7[%c32, %c0_11], %17 {strides = array<i32>} : memref<36x384xf32, #tpu.memory_space<vmem>>, vector<4x384xf32>,
    %c0_12 = arith.constant 0 : index
    %c0_13 = arith.constant 0 : index
    %19 = vector.load %arg7[%c0_12, %c0_13] : memref<36x384xf32, #tpu.memory_space<vmem>>, vector<36x384xf32>
    %20 = arith.truncf %19 : vector<36x384xf32> to vector<36x384xbf16>
    %c0_14 = arith.constant 0 : index
    %c0_15 = arith.constant 0 : index
    %21 = vector.load %arg2[%c0_14, %c0_15] : memref<128x36xbf16, #tpu.memory_space<vmem>>, vector<128x36xbf16>
    %cst = arith.constant dense<0.000000e+00> : vector<128x384xf32>
    %22 = tpu.matmul %21, %20, %cst {dimension_numbers = #tpu.dot_dimension_numbers<[1], [0], [0], [1], [0, 0, 1, 1], [], []>} : vector<128x36xbf16>, vector<36x384xbf16>, vector<128x384xf32> -> vector<128x384xf32>
    %c0_16 = arith.constant 0 : index
    %c0_17 = arith.constant 0 : index
    %23 = vector.load %arg3[%c0_16, %c0_17] : memref<128x1xf32, #tpu.memory_space<vmem>>, vector<128x1xf32>
    %24 = vector.broadcast %23 : vector<128x1xf32> to vector<128x384xf32>
    %25 = arith.addf %22, %24 : vector<128x384xf32>
    %cst_18 = arith.constant 0.000000e+00 : f32
    %26 = vector.broadcast %cst_18 : f32 to vector<128x384xf32>
    %27 = arith.maximumf %25, %26 : vector<128x384xf32>
    %c0_19 = arith.constant 0 : index
    %c0_20 = arith.constant 0 : index
    %28 = vector.load %arg4[%c0_19, %c0_20] : memref<128x1xf32, #tpu.memory_space<vmem>>, vector<128x1xf32>
    %29 = vector.broadcast %28 : vector<128x1xf32> to vector<128x384xf32>
    %30 = arith.mulf %27, %29 : vector<128x384xf32>
    %cst_21 = arith.constant dense<0.000000e+00> : vector<384xf32>
    %31 = vector.multi_reduction <add>, %30, %cst_21 [0] : vector<128x384xf32> to vector<384xf32>
    %32 = vector.shape_cast %31 : vector<384xf32> to vector<1x384xf32>
    %c0_22 = arith.constant 0 : index
    %c0_23 = arith.constant 0 : index
    %33 = memref.load %arg5[%c0_22, %c0_23] : memref<1x1xf32, #tpu.memory_space<smem>>
    %34 = vector.broadcast %33 : f32 to vector<1x384xf32>
    %35 = arith.addf %32, %34 : vector<1x384xf32>
    %36 = arith.negf %35 : vector<1x384xf32>
    %37 = math.exp %36 : vector<1x384xf32>
    %cst_24 = arith.constant 1.000000e+00 : f32
    %38 = vector.broadcast %cst_24 : f32 to vector<1x384xf32>
    %39 = arith.addf %38, %37 : vector<1x384xf32>
    %40 = arith.divf %38, %39 : vector<1x384xf32>
    %c0_25 = arith.constant 0 : index
    %c0_26 = arith.constant 0 : index
    %c0_27 = arith.constant 0 : index
    %41 = vector.load %arg6[%c0_25, %c0_26, %c0_27] : memref<1x1x384xf32, #tpu.memory_space<vmem>>, vector<1x1x384xf32>
    %42 = vector.shape_cast %41 : vector<1x1x384xf32> to vector<1x384xf32>
    %43 = vector.shape_cast %40 : vector<1x384xf32> to vector<1x1x384xf32>
    tpu.vector_store %arg6[%c0_25, %c0_26, %c0_27], %43 {strides = array<i32>} : memref<1x1x384xf32, #tpu.memory_space<vmem>>, vector<1x1x384xf32>,
    return
  }
  func.func @transform_0(%arg0: i32) -> (i32, i32, i32) {
    %c0_i32 = arith.constant 0 : i32
    %c0_i32_0 = arith.constant 0 : i32
    %c0_i32_1 = arith.constant 0 : i32
    return %arg0, %c0_i32, %c0_i32_0 : i32, i32, i32
  }
  func.func @transform_1(%arg0: i32) -> (i32, i32) {
    %c0_i32 = arith.constant 0 : i32
    %c0_i32_0 = arith.constant 0 : i32
    %c0_i32_1 = arith.constant 0 : i32
    return %c0_i32, %c0_i32_0 : i32, i32
  }
  func.func @transform_2(%arg0: i32) -> (i32, i32) {
    %c0_i32 = arith.constant 0 : i32
    %c0_i32_0 = arith.constant 0 : i32
    %c0_i32_1 = arith.constant 0 : i32
    return %c0_i32, %c0_i32_0 : i32, i32
  }
  func.func @transform_3(%arg0: i32) -> (i32, i32) {
    %c0_i32 = arith.constant 0 : i32
    %c0_i32_0 = arith.constant 0 : i32
    %c0_i32_1 = arith.constant 0 : i32
    return %c0_i32, %c0_i32_0 : i32, i32
  }
  func.func @transform_4(%arg0: i32) -> (i32, i32) {
    %c0_i32 = arith.constant 0 : i32
    %c0_i32_0 = arith.constant 0 : i32
    %c0_i32_1 = arith.constant 0 : i32
    return %c0_i32, %c0_i32_0 : i32, i32
  }
  func.func @transform_5(%arg0: i32) -> (i32, i32, i32) {
    %c0_i32 = arith.constant 0 : i32
    %c0_i32_0 = arith.constant 0 : i32
    %c0_i32_1 = arith.constant 0 : i32
    return %arg0, %c0_i32, %c0_i32_0 : i32, i32, i32
  }
}

module attributes {stable_mosaic.version = 11 : i64} {
  func.func @_reco_head_kernel(%arg0: i32, %arg1: memref<16x128xbf16, #tpu.memory_space<vmem>>, %arg2: memref<128x128xbf16, #tpu.memory_space<vmem>>, %arg3: memref<128x128xbf16, #tpu.memory_space<vmem>>, %arg4: memref<1x128xf32, #tpu.memory_space<vmem>>, %arg5: memref<16x128xf32, #tpu.memory_space<vmem>>) attributes {dimension_semantics = [#tpu.dimension_semantics<parallel>], iteration_bounds = array<i64: 1>, scalar_prefetch = 0 : i64, scratch_operands = 0 : i64, tpu.core_type = #tpu.core_type<tc>, window_params = [{transform_indices = @transform_0, window_bounds = array<i64: 16, 128>}, {pipeline_mode = #tpu.pipeline_mode<synchronous>, transform_indices = @transform_1, window_bounds = array<i64: 128, 128>}, {pipeline_mode = #tpu.pipeline_mode<synchronous>, transform_indices = @transform_2, window_bounds = array<i64: 128, 128>}, {pipeline_mode = #tpu.pipeline_mode<synchronous>, transform_indices = @transform_3, window_bounds = array<i64: 1, 128>}, {transform_indices = @transform_4, window_bounds = array<i64: 16, 128>}]} {
    %c0 = arith.constant 0 : index
    %c0_0 = arith.constant 0 : index
    %0 = vector.load %arg1[%c0, %c0_0] : memref<16x128xbf16, #tpu.memory_space<vmem>>, vector<16x128xbf16>
    %c0_1 = arith.constant 0 : index
    %c0_2 = arith.constant 0 : index
    %1 = vector.load %arg2[%c0_1, %c0_2] : memref<128x128xbf16, #tpu.memory_space<vmem>>, vector<128x128xbf16>
    %cst = arith.constant dense<0.000000e+00> : vector<16x128xf32>
    %2 = tpu.matmul %0, %1, %cst {dimension_numbers = #tpu.dot_dimension_numbers<[1], [0], [0], [1], [0, 0, 1, 1], [], []>} : vector<16x128xbf16>, vector<128x128xbf16>, vector<16x128xf32> -> vector<16x128xf32>
    %cst_3 = arith.constant 0.000000e+00 : f32
    %3 = vector.broadcast %cst_3 : f32 to vector<16x128xf32>
    %4 = arith.maximumf %2, %3 : vector<16x128xf32>
    %5 = arith.truncf %4 : vector<16x128xf32> to vector<16x128xbf16>
    %c0_4 = arith.constant 0 : index
    %c0_5 = arith.constant 0 : index
    %6 = vector.load %arg3[%c0_4, %c0_5] : memref<128x128xbf16, #tpu.memory_space<vmem>>, vector<128x128xbf16>
    %cst_6 = arith.constant dense<0.000000e+00> : vector<16x128xf32>
    %7 = tpu.matmul %5, %6, %cst_6 {dimension_numbers = #tpu.dot_dimension_numbers<[1], [0], [0], [1], [0, 0, 1, 1], [], []>} : vector<16x128xbf16>, vector<128x128xbf16>, vector<16x128xf32> -> vector<16x128xf32>
    %c0_7 = arith.constant 0 : index
    %c0_8 = arith.constant 0 : index
    %8 = vector.load %arg4[%c0_7, %c0_8] : memref<1x128xf32, #tpu.memory_space<vmem>>, vector<1x128xf32>
    %9 = vector.broadcast %8 : vector<1x128xf32> to vector<16x128xf32>
    %10 = arith.addf %7, %9 : vector<16x128xf32>
    %cst_9 = arith.constant dense<0xFF800000> : vector<16xf32>
    %11 = vector.multi_reduction <maximumf>, %10, %cst_9 [1] : vector<16x128xf32> to vector<16xf32>
    %12 = vector.shape_cast %11 : vector<16xf32> to vector<16x1xf32>
    %13 = vector.broadcast %12 : vector<16x1xf32> to vector<16x128xf32>
    %14 = arith.subf %10, %13 : vector<16x128xf32>
    %15 = math.exp %14 : vector<16x128xf32>
    %16 = vector.broadcast %12 : vector<16x1xf32> to vector<16x128xf32>
    %17 = arith.subf %10, %16 : vector<16x128xf32>
    %cst_10 = arith.constant dense<0.000000e+00> : vector<16xf32>
    %18 = vector.multi_reduction <add>, %15, %cst_10 [1] : vector<16x128xf32> to vector<16xf32>
    %19 = vector.shape_cast %18 : vector<16xf32> to vector<16x1xf32>
    %20 = math.log %19 : vector<16x1xf32>
    %21 = vector.broadcast %20 : vector<16x1xf32> to vector<16x128xf32>
    %22 = arith.subf %17, %21 : vector<16x128xf32>
    %c0_11 = arith.constant 0 : index
    %c0_12 = arith.constant 0 : index
    %23 = vector.load %arg5[%c0_11, %c0_12] : memref<16x128xf32, #tpu.memory_space<vmem>>, vector<16x128xf32>
    tpu.vector_store %arg5[%c0_11, %c0_12], %22 {strides = array<i32>} : memref<16x128xf32, #tpu.memory_space<vmem>>, vector<16x128xf32>,
    return
  }
  func.func @transform_0(%arg0: i32) -> (i32, i32) {
    %c0_i32 = arith.constant 0 : i32
    %c0_i32_0 = arith.constant 0 : i32
    return %arg0, %c0_i32 : i32, i32
  }
  func.func @transform_1(%arg0: i32) -> (i32, i32) {
    %c0_i32 = arith.constant 0 : i32
    %c0_i32_0 = arith.constant 0 : i32
    %c0_i32_1 = arith.constant 0 : i32
    return %c0_i32, %c0_i32_0 : i32, i32
  }
  func.func @transform_2(%arg0: i32) -> (i32, i32) {
    %c0_i32 = arith.constant 0 : i32
    %c0_i32_0 = arith.constant 0 : i32
    %c0_i32_1 = arith.constant 0 : i32
    return %c0_i32, %c0_i32_0 : i32, i32
  }
  func.func @transform_3(%arg0: i32) -> (i32, i32) {
    %c0_i32 = arith.constant 0 : i32
    %c0_i32_0 = arith.constant 0 : i32
    %c0_i32_1 = arith.constant 0 : i32
    return %c0_i32, %c0_i32_0 : i32, i32
  }
  func.func @transform_4(%arg0: i32) -> (i32, i32) {
    %c0_i32 = arith.constant 0 : i32
    %c0_i32_0 = arith.constant 0 : i32
    return %arg0, %c0_i32 : i32, i32
  }
}

</mosaic_0001>

<bundles_post_ra>
// kernel: squeeze.2
= control target key start
LH: loop header
LB: loop body
LE: loop exit
PB: predicated region body
PF: predicated region fallthrough
CT: control target
= control target key end

     0   :  { %s128_s12 = smov 3  ;;  %s20_s13 = smov 3  ;;  %vm17_vm0 = vcmask 146432   ;;  %vm133_vm1 = vcmask 1014784   ;;  %vm146_vm2 = vcmask 1031168   ;;  %vm137_vm3 = vcmask 31744   ;;  %s307_s0 = inlined_call_operand.vmem [shape: f32[2,324], index: 0, kind: input, shape index: {}]   ;;  %s308_s1 = inlined_call_operand.vmem [shape: f32[2,18,18], index: 1, kind: output, shape index: {}]  }
   0x1   :  { %v14_v0 = vld [vmem:[%s307_s0] sm:$0x3]  ;;  %v157_v1 = vld [vmem:[%s307_s0 + $0x4] sm:$0x3]  ;;  %v158_v2 = vld [vmem:[%s307_s0 + $0x2] sm:$0x3] }
   0x2   :  { %15 = vst [vmem:[#allocation0] sm:$0x3] %v14_v0  ;;  %9 = vst [vmem:[#allocation0 + $0x10] sm:$0x3] %v157_v1  ;;  %s131_s0 = smov 3  ;;  %s28_s14 = smov 3 }
   0x3   :  { %13 = vst [vmem:[#allocation0 + $0x8] sm:$0x3] %v158_v2  ;;  %s195_s15 = smov 110   ;;  %s196_s18 = smov 114   ;;  %vm140_vm4 = vcmask 146464   ;;  %vm150_vm5 = vcmask 15360  }
   0x4   :  { %s42_s19 = smov 3  ;;  %s197_s20 = smov 4   ;;  %vm153_vm6 = vcmask 146448  }
   0x5   :  { %s198_s21 = smov 112   ;;  %s50_s22 = smov 3 }
   0x6   :  { %s199_s23 = smov 2   ;;  %s200_s24 = smov 96  }
   0x7   :  { %s64_s25 = smov 3  ;;  %s72_s26 = smov 3 }
   0x8   :  { %s201_s27 = smov 94   ;;  %s202_s28 = smov 92  }
   0x9   :  { %v35_v3 = vld [vmem:[#allocation0] sm:$0x3]   ;;  %v132_v5 = vld [vmem:[#allocation0 + $0x11] ss:$-1 sm:%s131_s0]   ;;  %s86_s29 = smov 3  ;;  %s203_s30 = smov 78  }
   0xa   :  { %v16_v4 = vld [vmem:[#allocation0] sm:$0x3]   ;;  %36 = vrot.lane.b32.xlu0 %v35_v3, %s195_s15  ;;  %v129_v6 = vld [vmem:[#allocation0 + $0x9] ss:$-1 sm:%s128_s12]   ;;  %v21_v7 = vld [vmem:[#allocation0 + $0x11] ss:$-1 sm:%s20_s13]  }
   0xb   :  { %18 = vst.msk [vmem:[%s308_s1] ss:$24 sm:$0x3] %vm17_vm0, %v16_v4   ;;  %v134_v8 = vsel %vm133_vm1, %v132_v5, %v129_v6  ;;  %22 = vrot.lane.b32.xlu1 %v21_v7, %s196_s18  ;;  %v143_v9 = vld [vmem:[#allocation0] sm:$0x3]   ;;  %s204_s2 = smov 76  }
   0xc   :  { %v145_v10 = vld [vmem:[#allocation0 + $0x8] sm:$0x3]   ;;  %v43_v13 = vld [vmem:[#allocation0 + $0x11] ss:$-1 sm:%s42_s19]   ;;  %v57_v15 = vld [vmem:[#allocation0] sm:$0x3]  }
   0xd   :  { %v29_v11 = vld [vmem:[#allocation0 + $0x9] ss:$-1 sm:%s28_s14]   ;;  %v147_v12 = vsel %vm146_vm2, %v145_v10, %v143_v9  ;;  %v65_v16 = vld [vmem:[#allocation0 + $0x11] ss:$-1 sm:%s64_s25]   ;;  %v79_v18 = vld [vmem:[#allocation0] sm:$0x3]  }
   0xe   :  { %135 = vrot.lane.b32.xlu0 %v134_v8, %s197_s20  ;;  %v51_v14 = vld [vmem:[#allocation0 + $0x9] ss:$-1 sm:%s50_s22]   ;;  %s100_s3 = smov 3  ;;  %s205_s4 = smov 74   ;;  %v93_v20 = vld [vmem:[#allocation0] sm:$0x3]  }
   0xf   :  { %30 = vrot.lane.b32.xlu1 %v29_v11, %s198_s21  ;;  %v73_v17 = vld [vmem:[#allocation0 + $0x9] ss:$-1 sm:%s72_s26]   ;;  %s206_s5 = smov 58   ;;  %s114_s6 = smov 3  ;;  %v107_v22 = vld [vmem:[#allocation0] sm:$0x3]  }
  0x10   :  { %v87_v19 = vld [vmem:[#allocation0 + $0x9] ss:$-1 sm:%s86_s29]   ;;  %s207_s7 = smov 56   ;;  %s208_s8 = smov 40   ;;  %v121_v24 = vld [vmem:[#allocation0] sm:$0x3]  }
  0x11   :  { %v101_v21 = vld [vmem:[#allocation0 + $0x9] ss:$-1 sm:%s100_s3]   ;;  %s209_s9 = smov 38   ;;  %s210_s10 = smov 22  }
  0x12   :  { %148 = vrot.lane.b32.xlu0 %v147_v12, %s199_s23  ;;  %v115_v23 = vld [vmem:[#allocation0 + $0x9] ss:$-1 sm:%s114_s6]   ;;  %s211_s11 = smov 20  }
  0x13   :  { %44 = vrot.lane.b32.xlu1 %v43_v13, %s200_s24 }
  0x16   :  { %52 = vrot.lane.b32.xlu0 %v51_v14, %s201_s27 }
  0x17   :  { %58 = vrot.lane.b32.xlu1 %v57_v15, %s202_s28 }
  0x1a   :  { %66 = vrot.lane.b32.xlu0 %v65_v16, %s203_s30 }
  0x1b   :  { %74 = vrot.lane.b32.xlu1 %v73_v17, %s204_s2 }
  0x1e   :  { %80 = vrot.lane.b32.xlu0 %v79_v18, %s205_s4 }
  0x1f   :  { %88 = vrot.lane.b32.xlu1 %v87_v19, %s206_s5 }
  0x22   :  { %94 = vrot.lane.b32.xlu0 %v93_v20, %s207_s7 }
  0x23   :  { %102 = vrot.lane.b32.xlu1 %v101_v21, %s208_s8 }
  0x26   :  { %108 = vrot.lane.b32.xlu0 %v107_v22, %s209_s9 }
  0x27   :  { %116 = vrot.lane.b32.xlu1 %v115_v23, %s210_s10 }
  0x2a   :  { %122 = vrot.lane.b32.xlu0 %v121_v24, %s211_s11 }
  0x7c   :  { %v37_v25 = vpop.permute.xlu0 %36  }
  0x7d   :  { %161 = vst.msk [vmem:[%s308_s1 + $0x1] ss:$24 sm:$0x3] %vm17_vm0, %v37_v25   ;;  %v23_v26 = vpop.permute.xlu1 %22  }
  0x7e   :  { %159 = vst.msk [vmem:[%s308_s1 + $0x27] ss:$-24 sm:$0x3] %vm17_vm0, %v23_v26  }
  0x80   :  { %v136_v27 = vpop.permute.xlu0 %135  }
  0x81   :  { %174 = vst.msk [vmem:[%s308_s1 + $0x26] ss:$-24 sm:$0x3] %vm137_vm3, %v136_v27   ;;  %v31_v28 = vpop.permute.xlu1 %30  }
  0x82   :  { %175 = vst.msk [vmem:[%s308_s1 + $0x26] ss:$-24 sm:$0x3] %vm140_vm4, %v136_v27  }
  0x83   :  { %160 = vst.msk [vmem:[%s308_s1 + $0x20] ss:$-24 sm:$0x3] %vm17_vm0, %v31_v28  }
  0x84   :  { %v149_v29 = vpop.permute.xlu0 %148  }
  0x85   :  { %176 = vst.msk [vmem:[%s308_s1 + $0x7] ss:$24 sm:$0x3] %vm150_vm5, %v149_v29   ;;  %v45_v30 = vpop.permute.xlu1 %44  }
  0x86   :  { %177 = vst.msk [vmem:[%s308_s1 + $0x7] ss:$24 sm:$0x3] %vm153_vm6, %v149_v29  }
  0x87   :  { %162 = vst.msk [vmem:[%s308_s1 + $0x28] ss:$-24 sm:$0x3] %vm17_vm0, %v45_v30  }
  0x88   :  { %v53_v31 = vpop.permute.xlu0 %52  }
  0x89   :  { %163 = vst.msk [vmem:[%s308_s1 + $0x21] ss:$-24 sm:$0x3] %vm17_vm0, %v53_v31   ;;  %v59_v32 = vpop.permute.xlu1 %58  }
  0x8a   :  { %164 = vst.msk [vmem:[%s308_s1 + $0x2] ss:$24 sm:$0x3] %vm17_vm0, %v59_v32  }
  0x8c   :  { %v67_v33 = vpop.permute.xlu0 %66  }
  0x8d   :  { %165 = vst.msk [vmem:[%s308_s1 + $0x29] ss:$-24 sm:$0x3] %vm17_vm0, %v67_v33   ;;  %v75_v34 = vpop.permute.xlu1 %74  }
  0x8e   :  { %166 = vst.msk [vmem:[%s308_s1 + $0x22] ss:$-24 sm:$0x3] %vm17_vm0, %v75_v34  }
  0x90   :  { %v81_v35 = vpop.permute.xlu0 %80  }
  0x91   :  { %167 = vst.msk [vmem:[%s308_s1 + $0x3] ss:$24 sm:$0x3] %vm17_vm0, %v81_v35   ;;  %v89_v36 = vpop.permute.xlu1 %88  }
  0x92   :  { %168 = vst.msk [vmem:[%s308_s1 + $0x23] ss:$-24 sm:$0x3] %vm17_vm0, %v89_v36  }
  0x94   :  { %v95_v37 = vpop.permute.xlu0 %94  }
  0x95   :  { %169 = vst.msk [vmem:[%s308_s1 + $0x4] ss:$24 sm:$0x3] %vm17_vm0, %v95_v37   ;;  %v103_v38 = vpop.permute.xlu1 %102  }
  0x96   :  { %170 = vst.msk [vmem:[%s308_s1 + $0x24] ss:$-24 sm:$0x3] %vm17_vm0, %v103_v38  }
  0x98   :  { %v109_v39 = vpop.permute.xlu0 %108  }
  0x99   :  { %171 = vst.msk [vmem:[%s308_s1 + $0x5] ss:$24 sm:$0x3] %vm17_vm0, %v109_v39   ;;  %v117_v40 = vpop.permute.xlu1 %116  }
  0x9a   :  { %172 = vst.msk [vmem:[%s308_s1 + $0x25] ss:$-24 sm:$0x3] %vm17_vm0, %v117_v40  }
  0x9c   :  { %v123_v41 = vpop.permute.xlu0 %122  }
  0x9d   :  { %173 = vst.msk [vmem:[%s308_s1 + $0x6] ss:$24 sm:$0x3] %vm17_vm0, %v123_v41  }

// kernel: _pipeline.2
= control target key start
LH: loop header
LB: loop body
LE: loop exit
PB: predicated region body
PF: predicated region fallthrough
CT: control target
= control target key end

     0   :  { %s1329_s20 = smov 0   ;;  %s1719_s0 = inlined_call_operand.vmem [shape: f32[2,4,384], index: 0, kind: input, shape index: {}]   ;;  %s1720_s1 = inlined_call_operand.vmem [shape: bf16[128,36], index: 1, kind: input, shape index: {}]   ;;  %s1721_s2 = inlined_call_operand.vmem [shape: f32[128,1], index: 2, kind: input, shape index: {}]   ;;  %s1722_s3 = inlined_call_operand.vmem [shape: f32[128,1], index: 3, kind: input, shape index: {}]   ;;  %s1723_s4 = inlined_call_operand.<no memory space> [shape: f32[1,1], index: 4, kind: input, shape index: {}]   ;;  %s1724_s5 = inlined_call_operand.vmem [shape: f32[2,1,384], index: 5, kind: output, shape index: {}]  }
   0x1   :  { %10 = sst [smem:[#allocation3]] %s1723_s4 }
   0x2 LB: > { %s1159_s21 = sadd.s32 4294967295, %s1284_s20   ;;  %p1163_p0 = scmp.ge.s32.totalorder %s1284_s20, 1  ;;  %s1284_s20 = sphi %s1329_s20, %s16_s20  }
   0x3   : > { %p188_p1 = scmp.lt.s32.totalorder %s1284_s20, 3 }
   0x5   : > { %p189_p2 = pnand %p1163_p0, %p188_p1 }
   0x6   : > { %p215_p3 = scmp.lt.s32.totalorder (!%p189_p2), %s1159_s21, 1  ;;  %s1286_s25 = smov (!%p189_p2), 109  }
   0x7   : > { %192 = sbr.rel (%p189_p2) target bundleno = 501 (0x1f5), region = 40  ;;  %s1287_s26 = smov (!%p189_p2), 127  }
   0x8   : > { %s1288_s27 = smov (!%p189_p2), 110   ;;  %s1289_s28 = smov (!%p189_p2), 111  }
   0x9   : > { %s1290_s29 = smov (!%p189_p2), 18   ;;  %s1291_s30 = smov (!%p189_p2), 1  }
   0xa   : > { %s1292_s6 = smov (!%p189_p2), 19   ;;  %s1293_s7 = smov (!%p189_p2), 17  }
   0xb   : > { %s1051_s16 = sld [smem:[#allocation3]] (!%p189_p2) }
   0xc   : > { %s1730_s21 = smov (!%p215_p3, %s1159_s21), 1  ;;  %v1294_v3 = vmov 0   ;;  %v416_v4 = vld [vmem:[%s1721_s2 + $0x8] sm:$0xff]  ;;  %v415_v5 = vld [vmem:[%s1721_s2] sm:$0xff]  ;;  %v417_v6 = vld [vmem:[%s1721_s2 + $0x10] sm:$0xff]  ;;  %v1725_v33 = vlaneseq  ;;  %vm576_vm4 = vcmask 1041408  }
   0xd   : > { %s1235_s4 = smul.u32 12, %s1730_s21  ;;  %618 = vmatprep.mubr.bf16.mxu0 %v1294_v3  ;;  %678 = vmatprep.mubr.bf16.mxu1 %v1294_v3  ;;  %v418_v7 = vld [vmem:[%s1721_s2 + $0x18] sm:$0xff]  ;;  %v844_v8 = vld [vmem:[%s1722_s3] sm:$0xff]  ;;  %v845_v9 = vld [vmem:[%s1722_s3 + $0x8] sm:$0xff]  ;;  %vm551_vm9 = vcmask 293888  }
   0xe   : > { %1256 = vset.pattern.permute.xlu1 %v1294_v3  ;;  %1255 = vset.pattern.permute.xlu0 %v1294_v3  ;;  %v419_v10 = vld [vmem:[%s1721_s2 + $0x20] sm:$0xff]  ;;  %v846_v11 = vld [vmem:[%s1722_s3 + $0x10] sm:$0xff]  ;;  %v420_v12 = vld [vmem:[%s1721_s2 + $0x28] sm:$0xff]  ;;  %v1441_v36 = vand.u32 127, %v1725_v33  ;;  %s1236_s17 = smul.u32 3, %s1730_s21 }
   0xf   : > { %s219_s24 = scalar_lea.vmem %s1719_s0, %s1235_s4  ;;  %v847_v13 = vld [vmem:[%s1722_s3 + $0x18] sm:$0xff]  ;;  %v421_v14 = vld [vmem:[%s1721_s2 + $0x30] sm:$0xff]  ;;  %v848_v15 = vld [vmem:[%s1722_s3 + $0x20] sm:$0xff] }
  0x10   : > { %v226_v0 = vld [vmem:[%s219_s24 + $0x8] sm:$0xf]  ;;  %v225_v1 = vld [vmem:[%s219_s24] sm:$0xff]  ;;  %v422_v16 = vld [vmem:[%s1721_s2 + $0x38] sm:$0xff]  ;;  %vm368_vm0 = vcmp.lt.s32.totalorder %v1441_v36, 109  ;;  %vm311_vm1 = vcmp.lt.s32.totalorder %v1441_v36, 127  ;;  %s223_s4 = scalar_lea.vmem %s1724_s5, %s1236_s17 }
  0x11   : > { %366 = vrot.lane.b32.xlu1 %v226_v0, %s1286_s25  ;;  %302 = vst [vmem:[#allocation2 + $0x8] sm:$0xf] %v225_v1  ;;  %304 = vst [vmem:[#allocation2 + $0x40] sm:$0xf] %v226_v0  ;;  %362 = vrot.lane.b32.xlu0 %v225_v1, %s1286_s25  ;;  %v228_v2 = vcombine.high %v225_v1, %v225_v1  ;;  %v849_v17 = vld [vmem:[%s1722_s3 + $0x28] sm:$0xff]  ;;  %v423_v18 = vld [vmem:[%s1721_s2 + $0x40] sm:$0xff] }
  0x12   : > { %v850_v19 = vld [vmem:[%s1722_s3 + $0x30] sm:$0xff]  ;;  %v424_v20 = vld [vmem:[%s1721_s2 + $0x48] sm:$0xff]  ;;  %v851_v21 = vld [vmem:[%s1722_s3 + $0x38] sm:$0xff]  ;;  %vm346_vm2 = vcmp.lt.s32.totalorder %v1441_v36, 110  ;;  %vm333_vm3 = vcmp.lt.s32.totalorder %v1441_v36, 111  ;;  %vm251_vm5 = vcmp.lt.s32.totalorder %v1441_v36, 18 }
  0x13   : > { %303 = vst [vmem:[#allocation2 + $0x48] sm:$0xf] %v228_v2  ;;  %v425_v22 = vld [vmem:[%s1721_s2 + $0x50] sm:$0xff]  ;;  %v852_v23 = vld [vmem:[%s1722_s3 + $0x40] sm:$0xff]  ;;  %v426_v24 = vld [vmem:[%s1721_s2 + $0x58] sm:$0xff]  ;;  %vm286_vm6 = vcmp.lt.s32.totalorder %v1441_v36, 1 }
  0x14   : > { %v853_v25 = vld [vmem:[%s1722_s3 + $0x48] sm:$0xff]  ;;  %v427_v26 = vld [vmem:[%s1721_s2 + $0x60] sm:$0xff]  ;;  %v854_v27 = vld [vmem:[%s1722_s3 + $0x50] sm:$0xff]  ;;  %vm238_vm7 = vcmp.lt.s32.totalorder %v1441_v36, 19  ;;  %vm273_vm8 = vcmp.lt.s32.totalorder %v1441_v36, 17 }
  0x15   : > { %309 = vrot.lane.b32.xlu0 %v226_v0, %s1287_s26  ;;  %307 = vrot.lane.b32.xlu1 %v228_v2, %s1287_s26  ;;  %v428_v28 = vld [vmem:[%s1721_s2 + $0x68] sm:$0xff]  ;;  %v855_v29 = vld [vmem:[%s1722_s3 + $0x58] sm:$0xff] }
  0x16   : > { %v429_v30 = vld [vmem:[%s1721_s2 + $0x70] sm:$0xff]  ;;  %v856_v31 = vld [vmem:[%s1722_s3 + $0x60] sm:$0xff]  ;;  %v430_v32 = vld [vmem:[%s1721_s2 + $0x78] sm:$0xff] }
  0x17   : > { %v857_v34 = vld [vmem:[%s1722_s3 + $0x68] sm:$0xff]  ;;  %v858_v35 = vld [vmem:[%s1722_s3 + $0x70] sm:$0xff]  ;;  %v859_v37 = vld [vmem:[%s1722_s3 + $0x78] sm:$0xff] }
  0x18   : > { %v1259_v36 = vld [vmem:[%s1720_s1 + $0x30] sm:$0xff]  }
  0x19   : > { %342 = vrot.lane.b32.xlu1 %v228_v2, %s1288_s27  ;;  %364 = vrot.lane.b32.xlu0 %v228_v2, %s1286_s25 }
  0x1d   : > { %305 = vrot.lane.b32.xlu1 %v225_v1, %s1287_s26  ;;  %344 = vrot.lane.b32.xlu0 %v226_v0, %s1288_s27 }
  0x21   : > { %329 = vrot.lane.b32.xlu1 %v228_v2, %s1289_s28  ;;  %340 = vrot.lane.b32.xlu0 %v225_v1, %s1288_s27 }
  0x25   : > { %327 = vrot.lane.b32.xlu1 %v225_v1, %s1289_s28  ;;  %331 = vrot.lane.b32.xlu0 %v226_v0, %s1289_s28 }
  0x29   : > { %247 = vrot.lane.b32.xlu1 %v228_v2, %s1290_s29  ;;  %245 = vrot.lane.b32.xlu0 %v225_v1, %s1290_s29 }
  0x2d   : > { %282 = vrot.lane.b32.xlu1 %v228_v2, %s1291_s30  ;;  %280 = vrot.lane.b32.xlu0 %v225_v1, %s1291_s30 }
  0x31   : > { %284 = vrot.lane.b32.xlu1 %v226_v0, %s1291_s30  ;;  %249 = vrot.lane.b32.xlu0 %v226_v0, %s1290_s29 }
  0x35   : > { %232 = vrot.lane.b32.xlu1 %v228_v2, %s1292_s6  ;;  %230 = vrot.lane.b32.xlu0 %v225_v1, %s1292_s6 }
  0x39   : > { %269 = vrot.lane.b32.xlu1 %v228_v2, %s1293_s7  ;;  %267 = vrot.lane.b32.xlu0 %v225_v1, %s1293_s7 }
  0x3d   : > { %271 = vrot.lane.b32.xlu1 %v226_v0, %s1293_s7  ;;  %234 = vrot.lane.b32.xlu0 %v226_v0, %s1292_s6 }
  0x41   : > { %438 = vperm.xlu1 %1256, %v416_v4   ;;  %433 = vperm.xlu0 %1255, %v415_v5  }
  0x45   : > { %443 = vperm.xlu1 %1256, %v417_v6   ;;  %448 = vperm.xlu0 %1255, %v418_v7  }
  0x49   : > { %862 = vperm.xlu1 %1256, %v844_v8   ;;  %867 = vperm.xlu0 %1255, %v845_v9  }
  0x4d   : > { %453 = vperm.xlu1 %1256, %v419_v10   ;;  %872 = vperm.xlu0 %1255, %v846_v11  }
  0x51   : > { %458 = vperm.xlu1 %1256, %v420_v12   ;;  %877 = vperm.xlu0 %1255, %v847_v13  }
  0x55   : > { %463 = vperm.xlu1 %1256, %v421_v14   ;;  %882 = vperm.xlu0 %1255, %v848_v15  }
  0x59   : > { %468 = vperm.xlu1 %1256, %v422_v16   ;;  %887 = vperm.xlu0 %1255, %v849_v17  }
  0x5d   : > { %473 = vperm.xlu1 %1256, %v423_v18   ;;  %892 = vperm.xlu0 %1255, %v850_v19  }
  0x61   : > { %478 = vperm.xlu1 %1256, %v424_v20   ;;  %897 = vperm.xlu0 %1255, %v851_v21  }
  0x65   : > { %483 = vperm.xlu1 %1256, %v425_v22   ;;  %902 = vperm.xlu0 %1255, %v852_v23  }
  0x69   : > { %488 = vperm.xlu1 %1256, %v426_v24   ;;  %907 = vperm.xlu0 %1255, %v853_v25  }
  0x6d   : > { %493 = vperm.xlu1 %1256, %v427_v26   ;;  %912 = vperm.xlu0 %1255, %v854_v27  }
  0x71   : > { %498 = vperm.xlu1 %1256, %v428_v28   ;;  %917 = vperm.xlu0 %1255, %v855_v29  }
  0x75   : > { %503 = vperm.xlu1 %1256, %v429_v30   ;;  %922 = vperm.xlu0 %1255, %v856_v31  }
  0x79   : > { %508 = vperm.xlu1 %1256, %v430_v32   ;;  %927 = vperm.xlu0 %1255, %v857_v34  }
  0x7d   : > { %932 = vperm.xlu1 %1256, %v858_v35   ;;  %937 = vperm.xlu0 %1255, %v859_v37  }
  0x83   : > { %v367_v38 = vpop.permute.xlu1 %366  ;;  %v363_v39 = vpop.permute.xlu0 %362 }
  0x84   : > { %v371_v40 = vsel %vm368_vm0, %v367_v38, %v363_v39 }
  0x85   : > { %374 = vst [vmem:[#allocation2 + $0x28] sm:$0xf] %v371_v40 }
  0x87   : > { %v310_v41 = vpop.permute.xlu0 %309  ;;  %v308_v42 = vpop.permute.xlu1 %307 }
  0x88   : > { %v312_v43 = vsel %vm311_vm1, %v308_v42, %v310_v41 }
  0x89   : > { %v319_v44 = vrot.slane %v312_v43, 4 }
  0x8b   : > { %325 = vst [vmem:[#allocation2 + $0x48] sm:$0xf0] %v319_v44  ;;  %v343_v45 = vpop.permute.xlu1 %342  ;;  %v365_v46 = vpop.permute.xlu0 %364 }
  0x8c   : > { %v369_v47 = vsel %vm368_vm0, %v365_v46, %v367_v38  ;;  %v370_v48 = vsel %vm368_vm0, %v363_v39, %v365_v46 }
  0x8d   : > { %372 = vst [vmem:[#allocation2 + $0x60] sm:$0xf] %v370_v48  ;;  %373 = vst [vmem:[#allocation2 + $0x70] sm:$0xf] %v369_v47 }
  0x8f   : > { %v306_v49 = vpop.permute.xlu1 %305  ;;  %v345_v50 = vpop.permute.xlu0 %344 }
  0x90   : > { %v313_v51 = vsel %vm311_vm1, %v306_v49, %v308_v42  ;;  %v314_v52 = vsel %vm311_vm1, %v310_v41, %v306_v49  ;;  %v347_v53 = vsel %vm346_vm2, %v343_v45, %v345_v50 }
  0x91   : > { %v318_v54 = vrot.slane %v313_v51, 4  ;;  %v320_v55 = vrot.slane %v314_v52, 4  ;;  %v354_v56 = vrot.slane %v347_v53, 4  ;;  %v389_v51 = vld [vmem:[#allocation2 + $0x28] sm:$0xf] }
  0x92   : > { %v382_v16 = vld [vmem:[#allocation2 + $0x48] sm:$0xff] }
  0x93   : > { %324 = vst [vmem:[#allocation2 + $0x8] sm:$0xf0] %v318_v54  ;;  %326 = vst [vmem:[#allocation2 + $0x40] sm:$0xf0] %v320_v55  ;;  %v330_v57 = vpop.permute.xlu1 %329  ;;  %v341_v58 = vpop.permute.xlu0 %340  ;;  %v398_v55 = vpack.c.bf16 %v389_v51, %v389_v51 }
  0x94   : > { %360 = vst [vmem:[#allocation2 + $0x10] sm:$0xf0] %v354_v56  ;;  %v348_v59 = vsel %vm346_vm2, %v341_v58, %v343_v45  ;;  %v349_v60 = vsel %vm346_vm2, %v345_v50, %v341_v58  ;;  %v388_v61 = vld [vmem:[#allocation2 + $0x70] sm:$0xf]  ;;  %v387_v62 = vld [vmem:[#allocation2 + $0x60] sm:$0xf] }
  0x95   : > { %v353_v63 = vrot.slane %v348_v59, 4  ;;  %v355_v0 = vrot.slane %v349_v60, 4  ;;  %v397_v1 = vpack.c.bf16 %v388_v61, %v388_v61  ;;  %v396_v2 = vpack.c.bf16 %v387_v62, %v387_v62  ;;  %v1258_v56 = vld [vmem:[%s1720_s1] sm:$0xff]  }
  0x96   : > { %v584_v59 = vsel %vm576_vm4, %v398_v55, 0 }
  0x97   : > { %359 = vst [vmem:[#allocation2 + $0x20] sm:$0xf0] %v353_v63  ;;  %361 = vst [vmem:[#allocation2 + $0x38] sm:$0xf0] %v355_v0  ;;  %v328_v4 = vpop.permute.xlu1 %327  ;;  %1173 = vmatprep.subr.msk.bf16.mxu0 %vm576_vm4, %v397_v1  ;;  %1228 = vmatprep.subr.msk.bf16.mxu1 %vm576_vm4, %v397_v1  ;;  %v332_v5 = vpop.permute.xlu0 %331  ;;  %v578_v6 = vsel %vm576_vm4, %v396_v2, 0  ;;  %v1260_v0 = vld [vmem:[%s1720_s1 + $0x8] sm:$0xff]  }
  0x98   : > { %v335_v7 = vsel %vm333_vm3, %v328_v4, %v330_v57  ;;  %v334_v8 = vsel %vm333_vm3, %v330_v57, %v332_v5  ;;  %v336_v9 = vsel %vm333_vm3, %v332_v5, %v328_v4  ;;  %597 = vmatpush1.bf16.msra.mxu0 %v578_v6  ;;  %1231 = vmatpush1.bf16.msra.mxu1 %v578_v6  ;;  %v1261_v1 = vld [vmem:[%s1720_s1 + $0x38] sm:$0xff]   ;;  %v1262_v2 = vld [vmem:[%s1720_s1 + $0x10] sm:$0xff]   ;;  %v1264_v5 = vld [vmem:[%s1720_s1 + $0x20] sm:$0xff]  }
  0x99   : > { %337 = vst [vmem:[#allocation2 + $0x20] sm:$0xf] %v335_v7  ;;  %338 = vst [vmem:[#allocation2 + $0x10] sm:$0xf] %v334_v8  ;;  %v1263_v4 = vld [vmem:[%s1720_s1 + $0x18] sm:$0xff]   ;;  %v1265_v6 = vld [vmem:[%s1720_s1 + $0x28] sm:$0xff]  }
  0x9a   : > { %339 = vst [vmem:[#allocation2 + $0x38] sm:$0xf] %v336_v9  ;;  %v381_v19 = vld [vmem:[#allocation2 + $0x8] sm:$0xff]  ;;  %v383_v58 = vld [vmem:[#allocation2 + $0x40] sm:$0xff] }
  0x9b   : > { %v248_v10 = vpop.permute.xlu1 %247  ;;  %v246_v11 = vpop.permute.xlu0 %245 }
  0x9c   : > { %v253_v12 = vsel %vm251_vm5, %v246_v11, %v248_v10 }
  0x9d   : > { %v259_v13 = vrot.slane %v253_v12, 4 }
  0x9f   : > { %265 = vst [vmem:[#allocation2] sm:$0xf0] %v259_v13  ;;  %v283_v14 = vpop.permute.xlu1 %282  ;;  %v281_v15 = vpop.permute.xlu0 %280 }
  0xa0   : > { %v288_v17 = vsel %vm286_vm6, %v281_v15, %v283_v14  ;;  %v385_v18 = vld [vmem:[#allocation2 + $0x10] sm:$0xff]  ;;  %v384_v20 = vld [vmem:[#allocation2 + $0x20] sm:$0xff] }
  0xa1   : > { %v294_v21 = vrot.slane %v288_v17, 4  ;;  %v394_v22 = vpack.c.bf16 %v385_v18, %v382_v16  ;;  %v393_v23 = vpack.c.bf16 %v384_v20, %v381_v19  ;;  %v386_v57 = vld [vmem:[#allocation2 + $0x38] sm:$0xff] }
  0xa2   : > { %v395_v60 = vpack.c.bf16 %v386_v57, %v383_v58 }
  0xa3   : > { %300 = vst [vmem:[#allocation2 + $0x50] sm:$0xf0] %v294_v21  ;;  %v285_v24 = vpop.permute.xlu1 %284  ;;  %v250_v25 = vpop.permute.xlu0 %249  ;;  %598 = vmatprep.subr.bf16.mxu0 %v394_v22  ;;  %1229 = vmatprep.subr.bf16.mxu1 %v394_v22 }
  0xa4   : > { %v287_v26 = vsel %vm286_vm6, %v283_v14, %v285_v24  ;;  %v289_v27 = vsel %vm286_vm6, %v285_v24, %v281_v15  ;;  %v252_v28 = vsel %vm251_vm5, %v248_v10, %v250_v25  ;;  %v254_v29 = vsel %vm251_vm5, %v250_v25, %v246_v11  ;;  %599 = vmatpush1.bf16.msra.mxu0 %v393_v23 }
  0xa5   : > { %v293_v30 = vrot.slane %v289_v27, 4  ;;  %v295_v31 = vrot.slane %v287_v26, 4  ;;  %v258_v32 = vrot.slane %v254_v29, 4  ;;  %v260_v34 = vrot.slane %v252_v28, 4  ;;  %1232 = vmatpush1.bf16.msra.mxu1 %v393_v23 }
  0xa7   : > { %299 = vst [vmem:[#allocation2 + $0x18] sm:$0xf0] %v293_v30  ;;  %301 = vst [vmem:[#allocation2 + $0x68] sm:$0xf0] %v295_v31  ;;  %v233_v35 = vpop.permute.xlu1 %232  ;;  %v231_v37 = vpop.permute.xlu0 %230 }
  0xa8   : > { %264 = vst [vmem:[#allocation2 + $0x30] sm:$0xf0] %v258_v32  ;;  %266 = vst [vmem:[#allocation2 + $0x58] sm:$0xf0] %v260_v34  ;;  %v240_v38 = vsel %vm238_vm7, %v231_v37, %v233_v35 }
  0xa9   : > { %243 = vst [vmem:[#allocation2] sm:$0xf] %v240_v38 }
  0xab   : > { %v270_v39 = vpop.permute.xlu1 %269  ;;  %v268_v40 = vpop.permute.xlu0 %267 }
  0xac   : > { %v275_v41 = vsel %vm273_vm8, %v268_v40, %v270_v39 }
  0xad   : > { %278 = vst [vmem:[#allocation2 + $0x50] sm:$0xf] %v275_v41 }
  0xaf   : > { %v272_v42 = vpop.permute.xlu1 %271  ;;  %v235_v43 = vpop.permute.xlu0 %234 }
  0xb0   : > { %v274_v44 = vsel %vm273_vm8, %v270_v39, %v272_v42  ;;  %v276_v45 = vsel %vm273_vm8, %v272_v42, %v268_v40  ;;  %v239_v46 = vsel %vm238_vm7, %v233_v35, %v235_v43  ;;  %v241_v47 = vsel %vm238_vm7, %v235_v43, %v231_v37  ;;  %v376_v48 = vld [vmem:[#allocation2] sm:$0xff] }
  0xb1   : > { %277 = vst [vmem:[#allocation2 + $0x18] sm:$0xf] %v276_v45  ;;  %279 = vst [vmem:[#allocation2 + $0x68] sm:$0xf] %v274_v44 }
  0xb2   : > { %242 = vst [vmem:[#allocation2 + $0x30] sm:$0xf] %v241_v47  ;;  %244 = vst [vmem:[#allocation2 + $0x58] sm:$0xf] %v239_v46 }
  0xb4   : > { %v379_v49 = vld [vmem:[#allocation2 + $0x50] sm:$0xff] }
  0xb5   : > { %v391_v50 = vpack.c.bf16 %v379_v49, %v376_v48 }
  0xb7   : > { %600 = vmatprep.subr.bf16.mxu0 %v391_v50  ;;  %1230 = vmatprep.subr.bf16.mxu1 %v391_v50 }
  0xb8   : > { %v378_v53 = vld [vmem:[#allocation2 + $0x18] sm:$0xff]  ;;  %v380_v62 = vld [vmem:[#allocation2 + $0x68] sm:$0xff] }
  0xb9   : > { %v375_v52 = vld [vmem:[#allocation2 + $0x30] sm:$0xff]  ;;  %v377_v61 = vld [vmem:[#allocation2 + $0x58] sm:$0xff] }
  0xba   : > { %v390_v54 = vpack.c.bf16 %v378_v53, %v375_v52  ;;  %v392_v63 = vpack.c.bf16 %v380_v62, %v377_v61 }
  0xbc   : > { %601 = vmatpush1.bf16.msra.mxu0 %v390_v54  ;;  %1233 = vmatpush1.bf16.msra.mxu1 %v390_v54  ;;  %v1535_v7 = vpop.permute.xlu1 %438  ;;  %v1537_v8 = vpop.permute.xlu0 %433 }
  0xbd   : > { %1234 = vmatprep.subr.msk.bf16.mxu1 %vm576_vm4, %v398_v55 }
  0xbf   : > { %1174 = vmatmul.mubr.msk.bf16.vlgmr.msra.gmra.mxu0 %vm551_vm9, %v1258_v56  ;;  %1180 = vmatmul.mubr.msk.bf16.vlgmr.msra.gmra.mxu1 %vm551_vm9, %v1259_v36 }
  0xc0   : > { %1207 = vmatpush3.bf16.msra.mxu1 %v584_v59  ;;  %628 = vmatprep.mubr.bf16.mxu0 %v1294_v3  ;;  %v1539_v9 = vpop.permute.xlu1 %443  ;;  %v1541_v10 = vpop.permute.xlu0 %448 }
  0xc1   : > { %1208 = vmatprep.subr.bf16.mxu1 %v395_v60  ;;  %688 = vmatprep.mubr.bf16.mxu1 %v1294_v3 }
  0xc4   : > { %1209 = vmatpush3.bf16.msra.mxu1 %v395_v60  ;;  %v1543_v11 = vpop.permute.xlu1 %862  ;;  %v1545_v12 = vpop.permute.xlu0 %867 }
  0xc5   : > { %1210 = vmatprep.subr.bf16.mxu1 %v392_v63 }
  0xc7   : > { %1175 = vmatmul.mubr.msk.bf16.gmra.mxu0 %vm551_vm9, %v1260_v0  ;;  %1181 = vmatmul.mubr.msk.bf16.gmra.mxu1 %vm551_vm9, %v1261_v1 }
  0xc8   : > { %1211 = vmatpush3.bf16.msra.mxu1 %v392_v63  ;;  %638 = vmatprep.mubr.bf16.mxu0 %v1294_v3  ;;  %v1547_v13 = vpop.permute.xlu1 %453 }
  0xc9   : > { %1212 = vmatprep.mubr.msk.bf16.mxu1 %vm551_vm9, %v1258_v56 }
  0xcc   : > { %v1551_v14 = vpop.permute.xlu1 %458 }
  0xcf   : > { %1176 = vmatmul.mubr.msk.bf16.gmra.mxu0 %vm551_vm9, %v1262_v2  ;;  %1213 = vmatmul.mubr.msk.bf16.vlgmr.msra.gmra.mxu1 %vm551_vm9, %v1260_v0 }
  0xd0   : > { %648 = vmatprep.mubr.bf16.mxu0 %v1294_v3  ;;  %1216 = vmatprep.mubr.msk.bf16.mxu1 %vm551_vm9, %v1262_v2  ;;  %v1555_v16 = vpop.permute.xlu1 %463 }
  0xd4   : > { %v1559_v18 = vpop.permute.xlu1 %468 }
  0xd7   : > { %1177 = vmatmul.mubr.msk.bf16.gmra.mxu0 %vm551_vm9, %v1263_v4  ;;  %1217 = vmatmul.mubr.msk.bf16.gmra.mxu1 %vm551_vm9, %v1263_v4 }
  0xd8   : > { %658 = vmatprep.mubr.bf16.mxu0 %v1294_v3  ;;  %1220 = vmatprep.mubr.msk.bf16.mxu1 %vm551_vm9, %v1264_v5  ;;  %v1563_v20 = vpop.permute.xlu1 %473 }
  0xdc   : > { %v1567_v22 = vpop.permute.xlu1 %478 }
  0xdf   : > { %1178 = vmatmul.mubr.msk.bf16.gmra.mxu0 %vm551_vm9, %v1264_v5  ;;  %1221 = vmatmul.mubr.msk.bf16.gmra.mxu1 %vm551_vm9, %v1265_v6 }
  0xe0   : > { %668 = vmatprep.mubr.bf16.mxu0 %v1294_v3  ;;  %1224 = vmatprep.mubr.msk.bf16.mxu1 %vm551_vm9, %v1259_v36  ;;  %v1549_v3 = vpop.permute.xlu0 %872  ;;  %v1571_v24 = vpop.permute.xlu1 %483 }
  0xe4   : > { %v1553_v15 = vpop.permute.xlu0 %877  ;;  %v1575_v26 = vpop.permute.xlu1 %488 }
  0xe7   : > { %1179 = vmatmul.mubr.msk.bf16.gmra.mxu0 %vm551_vm9, %v1265_v6  ;;  %1225 = vmatmul.mubr.msk.bf16.gmra.mxu1 %vm551_vm9, %v1261_v1 }
  0xe8   : > { %v1557_v17 = vpop.permute.xlu0 %882  ;;  %v1579_v30 = vpop.permute.xlu1 %493 }
  0xec   : > { %v1561_v19 = vpop.permute.xlu0 %887  ;;  %v1583_v40 = vpop.permute.xlu1 %498 }
  0xf0   : > { %v1565_v21 = vpop.permute.xlu0 %892  ;;  %v1595_v57 = vpop.permute.xlu1 %503 }
  0xf4   : > { %v1569_v23 = vpop.permute.xlu0 %897 }
  0xf8   : > { %v1573_v25 = vpop.permute.xlu0 %902 }
  0xfc   : > { %v1577_v27 = vpop.permute.xlu0 %907 }
 0x100   : > { %v1581_v34 = vpop.permute.xlu0 %912 }
 0x104   : > { %v1587_v45 = vpop.permute.xlu0 %917 }
 0x108   : > { %v1603_v2 = vpop.permute.xlu0 %922 }
 0x17f   : > { %v620_v28 = vpop.f32.mrf.mxu0  ;;  %v680_v29 = vpop.f32.mrf.mxu1 }
 0x180   : > { %v621_v41 = vadd.f32 %v620_v28, %v1537_v8  ;;  %v681_v46 = vadd.f32 %v680_v29, %v1579_v30 }
 0x181   : > { %v622_v31 = vpop.f32.mrf.mxu0  ;;  %v682_v32 = vpop.f32.mrf.mxu1 }
 0x182   : > { %v623_v47 = vadd.f32 %v622_v31, %v1537_v8  ;;  %v683_v48 = vadd.f32 %v682_v32, %v1579_v30  ;;  %v796_v53 = vmax.f32 %v621_v41, 0.0  ;;  %v832_v58 = vmax.f32 %v681_v46, 0.0 }
 0x183   : > { %v624_v35 = vpop.f32.mrf.mxu0  ;;  %v684_v37 = vpop.f32.mrf.mxu1 }
 0x184   : > { %v625_v42 = vadd.f32 %v624_v35, %v1535_v7  ;;  %v797_v59 = vmax.f32 %v623_v47, 0.0  ;;  %v833_v61 = vmax.f32 %v683_v48, 0.0  ;;  %v1599_v62 = vadd.f32 %v684_v37, %v1583_v40 }
 0x185   : > { %v626_v38 = vpop.f32.mrf.mxu0  ;;  %v686_v39 = vpop.f32.mrf.mxu1  ;;  %v940_v29 = vmul.f32 %v1543_v11, %v796_v53 }
 0x186   : > { %v627_v49 = vadd.f32 %v626_v38, %v1535_v7  ;;  %v799_v54 = vmax.f32 %v625_v42, 0.0  ;;  %v1606_v4 = vadd.f32 %v686_v39, %v1583_v40  ;;  %v1615_v38 = vmul.f32 %v1603_v2, %v832_v58 }
 0x187   : > { %v630_v43 = vpop.f32.mrf.mxu0  ;;  %v690_v44 = vpop.f32.mrf.mxu1  ;;  %v941_v41 = vmul.f32 %v1543_v11, %v797_v59 }
 0x188   : > { %v631_v52 = vadd.f32 %v630_v43, %v1539_v9  ;;  %v800_v63 = vmax.f32 %v627_v49, 0.0  ;;  %v1609_v6 = vadd.f32 %v690_v44, %v1595_v57  ;;  %v943_v31 = vmul.f32 %v1545_v12, %v799_v54 }
 0x189   : > { %v632_v50 = vpop.f32.mrf.mxu0  ;;  %v692_v51 = vpop.f32.mrf.mxu1  ;;  %v1620_v43 = vmul.f32 %v1603_v2, %v833_v61  ;;  %v835_v44 = vmax.f32 %v1599_v62, 0.0 }
 0x18a   : > { %v633_v55 = vadd.f32 %v632_v50, %v1539_v9  ;;  %v802_v5 = vmax.f32 %v631_v52, 0.0  ;;  %v944_v46 = vmul.f32 %v1545_v12, %v800_v63  ;;  %v836_v50 = vmax.f32 %v1606_v4, 0.0 }
 0x18b   : > { %v634_v56 = vpop.f32.mrf.mxu0  ;;  %v694_v36 = vpop.f32.mrf.mxu1  ;;  %v1632_v63 = vadd.f32 %v692_v51, %v1595_v57  ;;  %v1727_v62 = vmax.f32 %v1609_v6, 0.0 }
 0x18c   : > { %v635_v60 = vadd.f32 %v634_v56, %v1541_v10  ;;  %v803_v32 = vmax.f32 %v633_v55, 0.0  ;;  %v946_v52 = vmul.f32 %v1549_v3, %v802_v5  ;;  %v988_v55 = vadd.f32 %v943_v31, %v940_v29 }
 0x18d   : > { %v636_v0 = vpop.f32.mrf.mxu0  ;;  %v1601_v1 = vpop.f32.mrf.mxu1 }
 0x18e   : > { %v637_v28 = vadd.f32 %v636_v0, %v1541_v10  ;;  %v805_v39 = vmax.f32 %v635_v60, 0.0  ;;  %v947_v56 = vmul.f32 %v1549_v3, %v803_v32 }
 0x18f   : > { %v640_v35 = vpop.f32.mrf.mxu0  ;;  %v1214_v37 = vpop.f32.mrf.mxu1 }
 0x190   : > { %v641_v42 = vadd.f32 %v640_v35, %v1547_v13  ;;  %v806_v47 = vmax.f32 %v637_v28, 0.0  ;;  %v742_v54 = vadd.f32 %v1214_v37, %v1539_v9  ;;  %v949_v0 = vmul.f32 %v1553_v15, %v805_v39 }
 0x191   : > { %v642_v48 = vpop.f32.mrf.mxu0  ;;  %v733_v49 = vpop.f32.mrf.mxu1  ;;  %v1009_v35 = vadd.f32 %v944_v46, %v941_v41 }
 0x192   : > { %v643_v58 = vadd.f32 %v642_v48, %v1547_v13  ;;  %v734_v59 = vadd.f32 %v733_v49, %v1537_v8  ;;  %v808_v28 = vmax.f32 %v641_v42, 0.0  ;;  %v950_v9 = vmul.f32 %v1553_v15, %v806_v47  ;;  %v1638_v48 = vpop.permute.xlu1 %508 }
 0x193   : > { %v644_v60 = vpop.f32.mrf.mxu0  ;;  %v1215_v61 = vpop.f32.mrf.mxu1  ;;  %v989_v8 = vadd.f32 %v988_v55, %v946_v52  ;;  %v804_v49 = vmax.f32 %v742_v54, 0.0  ;;  %v1010_v53 = vadd.f32 %v1009_v35, %v947_v56  ;;  %v1642_v39 = vadd.f32 %v694_v36, %v1638_v48 }
 0x194   : > { %v645_v5 = vadd.f32 %v644_v60, %v1551_v14  ;;  %v809_v29 = vmax.f32 %v643_v58, 0.0  ;;  %v745_v31 = vadd.f32 %v1215_v61, %v1541_v10  ;;  %v798_v42 = vmax.f32 %v734_v59, 0.0 }
 0x195   : > { %v646_v32 = vpop.f32.mrf.mxu0  ;;  %v736_v37 = vpop.f32.mrf.mxu1  ;;  %v990_v58 = vadd.f32 %v989_v8, %v949_v0  ;;  %v952_v10 = vmul.f32 %v1557_v17, %v808_v28  ;;  %v1011_v52 = vadd.f32 %v1010_v53, %v950_v9  ;;  %v948_v36 = vmul.f32 %v1549_v3, %v804_v49 }
 0x196   : > { %v811_v33 = vmax.f32 %v645_v5, 0.0  ;;  %v647_v51 = vadd.f32 %v646_v32, %v1551_v14  ;;  %v737_v41 = vadd.f32 %v736_v37, %v1535_v7  ;;  %v953_v54 = vmul.f32 %v1557_v17, %v809_v29 }
 0x197   : > { %v650_v46 = vpop.f32.mrf.mxu0  ;;  %v1218_v47 = vpop.f32.mrf.mxu1  ;;  %v807_v55 = vmax.f32 %v745_v31, 0.0  ;;  %v942_v28 = vmul.f32 %v1543_v11, %v798_v42  ;;  %v991_v37 = vadd.f32 %v990_v58, %v952_v10 }
 0x198   : > { %v812_v60 = vmax.f32 %v647_v51, 0.0  ;;  %v651_v61 = vadd.f32 %v650_v46, %v1555_v16  ;;  %v801_v5 = vmax.f32 %v737_v41, 0.0  ;;  %v955_v59 = vmul.f32 %v1561_v19, %v811_v33 }
 0x199   : > { %v652_v56 = vpop.f32.mrf.mxu0  ;;  %v749_v35 = vpop.f32.mrf.mxu1  ;;  %v758_v7 = vadd.f32 %v1218_v47, %v1555_v16  ;;  %v1012_v33 = vadd.f32 %v1011_v52, %v953_v54  ;;  %v951_v49 = vmul.f32 %v1553_v15, %v807_v55 }
 0x19a   : > { %v653_v0 = vadd.f32 %v652_v56, %v1555_v16  ;;  %v956_v32 = vmul.f32 %v1561_v19, %v812_v60  ;;  %v945_v53 = vmul.f32 %v1545_v12, %v801_v5  ;;  %v750_v9 = vadd.f32 %v749_v35, %v1547_v13 }
 0x19b   : > { %v654_v29 = vpop.f32.mrf.mxu0  ;;  %v1219_v31 = vpop.f32.mrf.mxu1  ;;  %v814_v8 = vmax.f32 %v651_v61, 0.0  ;;  %v992_v42 = vadd.f32 %v991_v37, %v955_v59  ;;  %v816_v47 = vmax.f32 %v758_v7, 0.0 }
 0x19c   : > { %v815_v51 = vmax.f32 %v653_v0, 0.0  ;;  %v655_v3 = vadd.f32 %v654_v29, %v1559_v18  ;;  %v1030_v41 = vadd.f32 %v945_v53, %v942_v28  ;;  %v810_v16 = vmax.f32 %v750_v9, 0.0 }
 0x19d   : > { %v656_v46 = vpop.f32.mrf.mxu0  ;;  %v752_v11 = vpop.f32.mrf.mxu1  ;;  %v761_v12 = vadd.f32 %v1219_v31, %v1559_v18  ;;  %v1013_v60 = vadd.f32 %v1012_v33, %v956_v32  ;;  %v958_v52 = vmul.f32 %v1565_v21, %v814_v8  ;;  %v960_v28 = vmul.f32 %v1565_v21, %v816_v47 }
 0x19e   : > { %v657_v13 = vadd.f32 %v656_v46, %v1559_v18  ;;  %v1031_v5 = vadd.f32 %v1030_v41, %v948_v36  ;;  %v817_v58 = vmax.f32 %v655_v3, 0.0  ;;  %v753_v10 = vadd.f32 %v752_v11, %v1551_v14 }
 0x19f   : > { %v660_v61 = vpop.f32.mrf.mxu0  ;;  %v1222_v56 = vpop.f32.mrf.mxu1  ;;  %v959_v15 = vmul.f32 %v1565_v21, %v815_v51  ;;  %v954_v35 = vmul.f32 %v1557_v17, %v810_v16  ;;  %v819_v14 = vmax.f32 %v761_v12, 0.0  ;;  %v993_v51 = vadd.f32 %v992_v42, %v958_v52 }
 0x1a0   : > { %v818_v54 = vmax.f32 %v657_v13, 0.0  ;;  %v661_v55 = vadd.f32 %v660_v61, %v1563_v20  ;;  %v1032_v59 = vadd.f32 %v1031_v5, %v951_v49  ;;  %v813_v7 = vmax.f32 %v753_v10, 0.0 }
 0x1a1   : > { %v774_v18 = vadd.f32 %v1222_v56, %v1571_v24  ;;  %v662_v0 = vpop.f32.mrf.mxu0  ;;  %v765_v36 = vpop.f32.mrf.mxu1  ;;  %v961_v29 = vmul.f32 %v1569_v23, %v817_v58  ;;  %v1014_v21 = vadd.f32 %v1013_v60, %v959_v15  ;;  %v963_v12 = vmul.f32 %v1569_v23, %v819_v14 }
 0x1a2   : > { %v820_v32 = vmax.f32 %v661_v55, 0.0  ;;  %v663_v53 = vadd.f32 %v662_v0, %v1563_v20  ;;  %v1033_v9 = vadd.f32 %v1032_v59, %v954_v35  ;;  %v957_v31 = vmul.f32 %v1561_v19, %v813_v7 }
 0x1a3   : > { %v766_v37 = vadd.f32 %v765_v36, %v1563_v20  ;;  %v664_v17 = vpop.f32.mrf.mxu0  ;;  %v1223_v8 = vpop.f32.mrf.mxu1  ;;  %v962_v3 = vmul.f32 %v1569_v23, %v818_v54  ;;  %v828_v33 = vmax.f32 %v774_v18, 0.0  ;;  %v994_v5 = vadd.f32 %v993_v51, %v961_v29 }
 0x1a4   : > { %v665_v49 = vadd.f32 %v664_v17, %v1567_v22  ;;  %v1034_v41 = vadd.f32 %v1033_v9, %v957_v31  ;;  %v821_v16 = vmax.f32 %v663_v53, 0.0  ;;  %v964_v19 = vmul.f32 %v1573_v25, %v820_v32 }
 0x1a5   : > { %v822_v46 = vmax.f32 %v766_v37, 0.0  ;;  %v666_v11 = vpop.f32.mrf.mxu0  ;;  %v768_v47 = vpop.f32.mrf.mxu1  ;;  %v777_v58 = vadd.f32 %v1223_v8, %v1575_v26  ;;  %v1015_v56 = vadd.f32 %v1014_v21, %v962_v3  ;;  %v972_v52 = vmul.f32 %v1581_v34, %v828_v33 }
 0x1a6   : > { %v823_v13 = vmax.f32 %v665_v49, 0.0  ;;  %v667_v20 = vadd.f32 %v666_v11, %v1567_v22  ;;  %v1035_v42 = vadd.f32 %v1034_v41, %v960_v28  ;;  %v769_v10 = vadd.f32 %v768_v47, %v1567_v22 }
 0x1a7   : > { %v670_v61 = vpop.f32.mrf.mxu0  ;;  %v1226_v60 = vpop.f32.mrf.mxu1  ;;  %v965_v23 = vmul.f32 %v1573_v25, %v821_v16  ;;  %v966_v55 = vmul.f32 %v1573_v25, %v822_v46  ;;  %v995_v0 = vadd.f32 %v994_v5, %v964_v19  ;;  %v831_v32 = vmax.f32 %v777_v58, 0.0 }
 0x1a8   : > { %v824_v15 = vmax.f32 %v667_v20, 0.0  ;;  %v671_v54 = vadd.f32 %v670_v61, %v1571_v24  ;;  %v1036_v35 = vadd.f32 %v1035_v42, %v963_v12  ;;  %v825_v59 = vmax.f32 %v769_v10, 0.0  ;;  %v928_v19 = vpop.permute.xlu0 %927 }
 0x1a9   : > { %v672_v7 = vpop.f32.mrf.mxu0  ;;  %v781_v18 = vpop.f32.mrf.mxu1  ;;  %v967_v36 = vmul.f32 %v1577_v27, %v823_v13  ;;  %v1016_v51 = vadd.f32 %v1015_v56, %v965_v23  ;;  %v790_v33 = vadd.f32 %v1226_v60, %v1595_v57 }
 0x1aa   : > { %v826_v22 = vmax.f32 %v671_v54, 0.0  ;;  %v673_v28 = vadd.f32 %v672_v7, %v1571_v24  ;;  %v1037_v14 = vadd.f32 %v1036_v35, %v966_v55  ;;  %v969_v53 = vmul.f32 %v1577_v27, %v825_v59  ;;  %v933_v23 = vpop.permute.xlu1 %932 }
 0x1ab   : > { %v782_v9 = vadd.f32 %v781_v18, %v1579_v30  ;;  %v674_v29 = vpop.f32.mrf.mxu0  ;;  %v1227_v31 = vpop.f32.mrf.mxu1  ;;  %v968_v25 = vmul.f32 %v1577_v27, %v824_v15  ;;  %v996_v41 = vadd.f32 %v995_v0, %v967_v36  ;;  %v975_v27 = vmul.f32 %v1587_v45, %v831_v32 }
 0x1ac   : > { %v970_v37 = vmul.f32 %v1581_v34, %v826_v22  ;;  %v827_v17 = vmax.f32 %v673_v28, 0.0  ;;  %v675_v8 = vadd.f32 %v674_v29, %v1575_v26  ;;  %v1038_v3 = vadd.f32 %v1037_v14, %v969_v53 }
 0x1ad   : > { %v834_v24 = vmax.f32 %v782_v9, 0.0  ;;  %v676_v49 = vpop.f32.mrf.mxu0  ;;  %v784_v21 = vpop.f32.mrf.mxu1  ;;  %v793_v47 = vadd.f32 %v1227_v31, %v1638_v48  ;;  %v1017_v13 = vadd.f32 %v1016_v51, %v968_v25  ;;  %v840_v42 = vmax.f32 %v790_v33, 0.0 }
 0x1ae   : > { %v971_v16 = vmul.f32 %v1581_v34, %v827_v17  ;;  %v829_v30 = vmax.f32 %v675_v8, 0.0  ;;  %v677_v46 = vadd.f32 %v676_v49, %v1575_v26  ;;  %v1039_v11 = vadd.f32 %v1038_v3, %v972_v52 }
 0x1af   : > { %v785_v12 = vadd.f32 %v784_v21, %v1583_v40  ;;  %v997_v20 = vadd.f32 %v996_v41, %v970_v37  ;;  %v978_v58 = vmul.f32 %v1603_v2, %v834_v24  ;;  %v697_v26 = vadd.f32 %v1601_v1, %v1638_v48 }
 0x1b0   : > { %v973_v57 = vmul.f32 %v1587_v45, %v829_v30  ;;  %v830_v5 = vmax.f32 %v677_v46, 0.0  ;;  %v1040_v34 = vadd.f32 %v1039_v11, %v975_v27  ;;  %v1018_v61 = vadd.f32 %v1017_v13, %v971_v16 }
 0x1b1   : > { %v837_v10 = vmax.f32 %v785_v12, 0.0  ;;  %v979_v40 = vmul.f32 %v928_v19, %v835_v44  ;;  %v843_v15 = vmax.f32 %v793_v47, 0.0  ;;  %v839_v55 = vmax.f32 %v1632_v63, 0.0 }
 0x1b2   : > { %v998_v60 = vadd.f32 %v997_v20, %v973_v57  ;;  %v974_v56 = vmul.f32 %v1587_v45, %v830_v5  ;;  %v1041_v52 = vadd.f32 %v1040_v34, %v978_v58  ;;  %v841_v2 = vmax.f32 %v1642_v39, 0.0  ;;  %v938_v45 = vpop.permute.xlu0 %937 }
 0x1b3   : > { %v981_v54 = vmul.f32 %v928_v19, %v837_v10  ;;  %v980_v1 = vmul.f32 %v928_v19, %v836_v50  ;;  %v984_v48 = vmul.f32 %v933_v23, %v840_v42  ;;  %v982_v44 = vmul.f32 %v933_v23, %v1727_v62 }
 0x1b4   : > { %v999_v35 = vadd.f32 %v998_v60, %v1615_v38  ;;  %v1019_v59 = vadd.f32 %v1018_v61, %v974_v56  ;;  %v842_v18 = vmax.f32 %v697_v26, 0.0  ;;  %v987_v22 = vmul.f32 %v938_v45, %v843_v15 }
 0x1b5   : > { %v1042_v7 = vadd.f32 %v1041_v52, %v981_v54  ;;  %v983_v28 = vmul.f32 %v933_v23, %v839_v55  ;;  %v985_v39 = vmul.f32 %v938_v45, %v841_v2  ;;  %v1052_v41 = vstv %s1051_s16 }
 0x1b6   : > { %v1000_v0 = vadd.f32 %v999_v35, %v979_v40  ;;  %v1020_v36 = vadd.f32 %v1019_v59, %v1620_v43  ;;  %v986_v53 = vmul.f32 %v938_v45, %v842_v18  ;;  %v1295_v26 = vmov 1966171168  }
 0x1b7   : > { %v1043_v63 = vadd.f32 %v1042_v7, %v984_v48  ;;  %v1079_v61 = vunpack.c.l.s4 %v1295_v26  ;;  %v1728_v56 = vlaneseq }
 0x1b8   : > { %v1001_v14 = vadd.f32 %v1000_v0, %v982_v44  ;;  %v1021_v38 = vadd.f32 %v1020_v36, %v980_v1 }
 0x1b9   : > { %v1044_v32 = vadd.f32 %v1043_v63, %v987_v22  ;;  %v1080_v60 = vunpack.c.0.s8 %v1079_v61  ;;  %v1082_v40 = vshrl.u32 %v1728_v56, 7  ;;  %vm1103_vm10 = vcmp.lt.s32.totalorder %v1728_v56, 384 }
 0x1ba   : > { %v1002_v4 = vadd.f32 %v1001_v14, %v985_v39  ;;  %v1022_v50 = vadd.f32 %v1021_v38, %v983_v28 }
 0x1bb   : > { %v1045_v9 = vrot.slane %v1044_v32, 4  ;;  %v1083_v54 = vsub.s32 %v1080_v60, %v1082_v40 }
 0x1bc   : > { %v1003_v29 = vrot.slane %v1002_v4, 4  ;;  %v1023_v31 = vadd.f32 %v1022_v50, %v986_v53 }
 0x1bd   : > { %v1046_v6 = vadd.f32 %v1045_v9, %v1044_v32 }
 0x1be   : > { %v1004_v25 = vadd.f32 %v1003_v29, %v1002_v4  ;;  %v1024_v37 = vrot.slane %v1023_v31, 4 }
 0x1bf   : > { %v1047_v17 = vrot.slane %v1046_v6, 2 }
 0x1c0   : > { %v1005_v8 = vrot.slane %v1004_v25, 2  ;;  %v1025_v43 = vadd.f32 %v1024_v37, %v1023_v31 }
 0x1c1   : > { %v1048_v51 = vadd.f32 %v1047_v17, %v1046_v6 }
 0x1c2   : > { %v1006_v3 = vadd.f32 %v1005_v8, %v1004_v25  ;;  %v1026_v33 = vrot.slane %v1025_v43, 2 }
 0x1c3   : > { %v1049_v24 = vrot.slane %v1048_v51, 1 }
 0x1c4   : > { %v1007_v49 = vrot.slane %v1006_v3, 1  ;;  %v1027_v21 = vadd.f32 %v1026_v33, %v1025_v43 }
 0x1c5   : > { %v1050_v16 = vadd.f32 %v1049_v24, %v1048_v51 }
 0x1c6   : > { %v1008_v30 = vadd.f32 %v1007_v49, %v1006_v3  ;;  %v1028_v46 = vrot.slane %v1027_v21, 1 }
 0x1c7   : > { %v1055_v27 = vadd.f32 %v1052_v41, %v1050_v16 }
 0x1c8   : > { %v1029_v11 = vadd.f32 %v1028_v46, %v1027_v21  ;;  %v1053_v47 = vadd.f32 %v1052_v41, %v1008_v30 }
 0x1c9   : > { %v1192_v12 = vmul.f32 -1.442695, %v1055_v27 }
 0x1ca   : > { %v1054_v19 = vadd.f32 %v1052_v41, %v1029_v11  ;;  %v1190_v13 = vmul.f32 -1.442695, %v1053_v47 }
 0x1cb   : > { %1266 = vpow2.f32 %v1192_v12 }
 0x1cc   : > { %1268 = vpow2.f32 %v1190_v13  ;;  %v1191_v20 = vmul.f32 -1.442695, %v1054_v19 }
 0x1ce   : > { %1270 = vpow2.f32 %v1191_v20 }
 0x1d8   : > { %v1267_v57 = vpop.eup %1266 }
 0x1d9   : > { %v1269_v5 = vpop.eup %1268  ;;  %v1067_v42 = vadd.f32 1.0, %v1267_v57 }
 0x1da   : > { %v1065_v58 = vadd.f32 1.0, %v1269_v5 }
 0x1db   : > { %v1271_v34 = vpop.eup %1270  ;;  %1272 = vrcp.f32 %v1067_v42 }
 0x1dc   : > { %v1066_v10 = vadd.f32 1.0, %v1271_v34  ;;  %1274 = vrcp.f32 %v1065_v58 }
 0x1de   : > { %1276 = vrcp.f32 %v1066_v10 }
 0x1e8   : > { %v1273_v52 = vpop.eup %1272 }
 0x1e9   : > { %v1275_v15 = vpop.eup %1274  ;;  %v1091_v35 = vrot.slane %v1273_v52, %v1083_v54 }
 0x1eb   : > { %v1277_v23 = vpop.eup %1276 }
 0x1ec   : > { %v1077_v55 = vcombine.low %v1275_v15, %v1277_v23 }
 0x1ee   : > { %v1084_v2 = vrot.slane %v1077_v55, %v1083_v54 }
 0x1f0   : > { %v1092_v59 = vcombine.low %v1084_v2, %v1091_v35 }
 0x1f2   : > { %v1099_v1 = vrot.slane %v1092_v59, %v1083_v54 }
 0x1f4   : > { %1105 = vst.msk [vmem:[%s223_s4] sm:$0x7] %vm1103_vm10, %v1099_v1 }
 0x1f5 PF: > { %s16_s20 = sadd.s32 1, %s1284_s20  }
 0x1f6   : > { %p13_p4 = scmp.ge.s32.totalorder %s16_s20, 4  }
 0x1f8   :  { %15 = sbr.rel (!%p13_p4) target bundleno = 2 (0x2), region = 70 }

// kernel: _pipeline.3
= control target key start
LH: loop header
LB: loop body
LE: loop exit
PB: predicated region body
PF: predicated region fallthrough
CT: control target
= control target key end

     0   :  { %v375_v0 = vmov 0.0   ;;  %vm376_vm0 = vmmov 0   ;;  %s462_s1 = inlined_call_operand.vmem [shape: bf16[128,128], index: 1, kind: input, shape index: {}]   ;;  %s463_s2 = inlined_call_operand.vmem [shape: bf16[128,128], index: 2, kind: input, shape index: {}]   ;;  %s464_s0 = inlined_call_operand.vmem [shape: bf16[16,128], index: 0, kind: input, shape index: {}]   ;;  %s465_s3 = inlined_call_operand.vmem [shape: f32[1,128], index: 3, kind: input, shape index: {}]   ;;  %s466_s4 = inlined_call_operand.vmem [shape: f32[16,128], index: 4, kind: output, shape index: {}]  }
   0x1   :  { %308 = vmatprep.subr.bf16.mxu0 %v375_v0  ;;  %v350_v1 = vld [vmem:[%s462_s1 + $0x38] sm:$0xff]   ;;  %324 = vmatprep.mubr.msk.bf16.mxu0 %vm376_vm0, %v375_v0  ;;  %v351_v2 = vld [vmem:[%s462_s1 + $0x30] sm:$0xff]   ;;  %v352_v3 = vld [vmem:[%s462_s1 + $0x28] sm:$0xff]  }
   0x2   :  { %328 = vmatprep.subr.bf16.mxu1 %v375_v0  ;;  %344 = vmatprep.mubr.msk.bf16.mxu1 %vm376_vm0, %v375_v0  ;;  %v359_v4 = vld [vmem:[%s463_s2 + $0x38] sm:$0xff]   ;;  %v353_v5 = vld [vmem:[%s462_s1 + $0x20] sm:$0xff]   ;;  %v360_v6 = vld [vmem:[%s463_s2 + $0x30] sm:$0xff]  }
   0x3   :  { %309 = vmatpush3.bf16.msra.mxu0 %v350_v1  ;;  %329 = vmatpush3.bf16.msra.mxu1 %v359_v4  ;;  %v354_v7 = vld [vmem:[%s462_s1 + $0x18] sm:$0xff]   ;;  %v361_v8 = vld [vmem:[%s463_s2 + $0x28] sm:$0xff]   ;;  %v355_v9 = vld [vmem:[%s462_s1 + $0x10] sm:$0xff]  }
   0x4   :  { %310 = vmatprep.subr.bf16.mxu0 %v375_v0  ;;  %330 = vmatprep.subr.bf16.mxu1 %v375_v0  ;;  %v362_v10 = vld [vmem:[%s463_s2 + $0x20] sm:$0xff]   ;;  %v356_v11 = vld [vmem:[%s462_s1 + $0x8] sm:$0xff]   ;;  %v363_v12 = vld [vmem:[%s463_s2 + $0x18] sm:$0xff]  }
   0x5   :  { %v357_v13 = vld [vmem:[%s462_s1] sm:$0xff]   ;;  %v364_v14 = vld [vmem:[%s463_s2 + $0x10] sm:$0xff]   ;;  %v365_v16 = vld [vmem:[%s463_s2 + $0x8] sm:$0xff]  }
   0x6   :  { %v358_v15 = vld [vmem:[%s464_s0] sm:$0xff]  }
   0x7   :  { %311 = vmatpush3.bf16.msra.mxu0 %v351_v2  ;;  %331 = vmatpush3.bf16.msra.mxu1 %v360_v6  ;;  %v366_v17 = vld [vmem:[%s463_s2] sm:$0xff]  }
   0x8   :  { %312 = vmatprep.subr.bf16.mxu0 %v375_v0  ;;  %332 = vmatprep.subr.bf16.mxu1 %v375_v0  ;;  %v281_v25 = vld [vmem:[%s465_s3] ss:$0 sm:$0xff] }
   0xb   :  { %313 = vmatpush3.bf16.msra.mxu0 %v352_v3  ;;  %333 = vmatpush3.bf16.msra.mxu1 %v361_v8 }
   0xc   :  { %314 = vmatprep.subr.bf16.mxu0 %v375_v0  ;;  %334 = vmatprep.subr.bf16.mxu1 %v375_v0 }
   0xf   :  { %315 = vmatpush3.bf16.msra.mxu0 %v353_v5  ;;  %335 = vmatpush3.bf16.msra.mxu1 %v362_v10 }
  0x10   :  { %316 = vmatprep.subr.bf16.mxu0 %v375_v0  ;;  %336 = vmatprep.subr.bf16.mxu1 %v375_v0 }
  0x13   :  { %317 = vmatpush3.bf16.msra.mxu0 %v354_v7  ;;  %337 = vmatpush3.bf16.msra.mxu1 %v363_v12 }
  0x14   :  { %318 = vmatprep.subr.bf16.mxu0 %v375_v0  ;;  %338 = vmatprep.subr.bf16.mxu1 %v375_v0 }
  0x17   :  { %319 = vmatpush3.bf16.msra.mxu0 %v355_v9  ;;  %339 = vmatpush3.bf16.msra.mxu1 %v364_v14 }
  0x18   :  { %320 = vmatprep.subr.bf16.mxu0 %v375_v0  ;;  %340 = vmatprep.subr.bf16.mxu1 %v375_v0 }
  0x1b   :  { %321 = vmatpush3.bf16.msra.mxu0 %v356_v11  ;;  %341 = vmatpush3.bf16.msra.mxu1 %v365_v16 }
  0x1c   :  { %322 = vmatprep.subr.bf16.mxu0 %v375_v0  ;;  %342 = vmatprep.subr.bf16.mxu1 %v375_v0 }
  0x1f   :  { %323 = vmatpush3.bf16.msra.mxu0 %v357_v13  ;;  %343 = vmatpush3.bf16.msra.mxu1 %v366_v17 }
  0x22   :  { %325 = vmatmul.mubr.bf16.vlgmr.msra.gmra.mxu0 %v358_v15 }
  0xe2   :  { %v124_v18 = vpop.f32.mrf.mxu0 }
  0xe3   :  { %v131_v21 = vmax.f32 %v124_v18, 0.0 }
  0xe4   :  { %v326_v19 = vpop.f32.mrf.mxu0 }
  0xe6   :  { %v127_v20 = vpop.f32.mrf.mxu0 }
  0xe7   :  { %v132_v22 = vmax.f32 %v127_v20, 0.0 }
  0xe8   :  { %v327_v23 = vpop.f32.mrf.mxu0 }
  0xe9   :  { %v133_v24 = vpack.c.bf16 %v132_v22, %v131_v21 }
  0xeb   :  { %345 = vmatmul.mubr.bf16.vlgmr.msra.gmra.mxu1 %v133_v24 }
 0x1ab   :  { %v239_v26 = vpop.f32.mrf.mxu1 }
 0x1ac   :  { %v240_v27 = vadd.f32 %v281_v25, %v239_v26 }
 0x1ad   :  { %v346_v28 = vpop.f32.mrf.mxu1 }
 0x1ae   :  { %246 = vmax.xlane.f32.xlu0 %v240_v27 }
 0x1af   :  { %v242_v29 = vpop.f32.mrf.mxu1 }
 0x1b0   :  { %v243_v30 = vadd.f32 %v281_v25, %v242_v29 }
 0x1b1   :  { %v347_v31 = vpop.f32.mrf.mxu1 }
 0x1b2   :  { %248 = vmax.xlane.f32.xlu0 %v243_v30 }
 0x237   :  { %v247_v32 = vpop.xlane.xlu0 %246 }
 0x238   :  { %v250_v33 = vsub.f32 %v240_v27, %v247_v32 }
 0x23a   :  { %v252_v34 = vmul.f32 1.442695, %v250_v33 }
 0x23b   :  { %v249_v35 = vpop.xlane.xlu0 %248 }
 0x23c   :  { %v251_v36 = vsub.f32 %v243_v30, %v249_v35  ;;  %367 = vpow2.f32 %v252_v34 }
 0x23e   :  { %v254_v37 = vmul.f32 1.442695, %v251_v36 }
 0x240   :  { %369 = vpow2.f32 %v254_v37 }
 0x249   :  { %v368_v38 = vpop.eup %367 }
 0x24a   :  { %256 = vadd.xlane.f32.xlu1 %v368_v38 }
 0x24d   :  { %v370_v39 = vpop.eup %369 }
 0x24e   :  { %258 = vadd.xlane.f32.xlu1 %v370_v39 }
 0x2d3   :  { %v257_v40 = vpop.xlane.xlu1 %256 }
 0x2d4   :  { %371 = vlog2.f32 %v257_v40 }
 0x2d7   :  { %v259_v41 = vpop.xlane.xlu1 %258 }
 0x2d8   :  { %373 = vlog2.f32 %v259_v41 }
 0x2e1   :  { %v372_v42 = vpop.eup %371 }
 0x2e2   :  { %v261_v43 = vmul.f32 0.6931472, %v372_v42 }
 0x2e4   :  { %v264_v44 = vsub.f32 %v250_v33, %v261_v43 }
 0x2e5   :  { %v374_v45 = vpop.eup %373 }
 0x2e6   :  { %266 = vst [vmem:[%s466_s4] sm:$0xff] %v264_v44  ;;  %v263_v46 = vmul.f32 0.6931472, %v374_v45 }
 0x2e8   :  { %v265_v47 = vsub.f32 %v251_v36, %v263_v46 }
 0x2ea   :  { %267 = vst [vmem:[%s466_s4 + $0x8] sm:$0xff] %v265_v47 }

</bundles_post_ra>
